<compile_context>
chip_gen: v5e
topology: v5e:2x2
jax: 0.10.0
libtpu: 0.0.40
codegen_flags: <defaults>
</compile_context>

<pallas_src>
import functools

import jax
import jax.numpy as jnp
import numpy as np
from jax import lax
from jax.experimental import pallas as pl
from jax.experimental.pallas import tpu as pltpu

_BN_EPS = 1e-5


def _vmem_specs(n):
    return [pl.BlockSpec(memory_space=pltpu.MemorySpace.VMEM) for _ in range(n)]


def _final_out_features(config):
    assert config[-1][0] == 'linear', "fused kernel expects the config to end with 'linear'"
    return config[-1][1][0]


# --------------------------------------------------------------------------------------
# One-time parameter packing (plain XLA, outside the hot path):
#   conv weight  -> block-diagonal matmul weight, bias -> lane-tiled row
#   bn params    -> (1, C) rows
#   linear weight-> rows permuted to the kernel's NHWC flatten order
# --------------------------------------------------------------------------------------
def prepare_params(config, vars_, vars_bn, H0, W0, C0):
    prepared = []
    idx = 0
    bn_idx = 0
    H, W, C = H0, W0, C0
    flat_dims = None
    for name, param in config:
        if name == 'conv2d':
            w, b = vars_[idx], vars_[idx + 1]
            idx += 2
            cout, cin, kh, kw = w.shape
            stride, pad = param[4], param[5]
            assert stride == 1, "TODO(synk): only stride-1 convs supported by the fused kernel"
            assert cin == C
            Ho = H + 2 * pad - kh + 1
            Wo = W + 2 * pad - kw + 1
            # W_big[t*Wo*cin + w*cin + ci, w'*cout + co] = w[co, ci, di, dj] * (w == w')
            wt = jnp.transpose(w, (2, 3, 1, 0)).reshape(kh * kw, cin, cout).astype(jnp.float32)
            eye = jnp.eye(Wo, dtype=jnp.float32)
            w_big = jnp.einsum('tio,wv->twivo', wt, eye).reshape(kh * kw * Wo * cin, Wo * cout)
            b_lane = jnp.tile(b.astype(jnp.float32), Wo).reshape(1, Wo * cout)
            prepared += [w_big, b_lane]
            H, W, C = Ho, Wo, cout
        elif name == 'bn':
            g, bt = vars_[idx], vars_[idx + 1]
            idx += 2
            rm, rv = vars_bn[bn_idx], vars_bn[bn_idx + 1]
            bn_idx += 2
            c = g.shape[0]
            assert c == C
            prepared += [g.reshape(1, c).astype(jnp.float32),
                         bt.reshape(1, c).astype(jnp.float32),
                         rm.reshape(1, c).astype(jnp.float32),
                         rv.reshape(1, c).astype(jnp.float32)]
        elif name == 'linear':
            w, b = vars_[idx], vars_[idx + 1]
            idx += 2
            out_f, in_f = w.shape
            if flat_dims is not None:
                Hf, Wf, Cf = flat_dims
                assert in_f == Hf * Wf * Cf
                # torch flattens NCHW: in-index = c*Hf*Wf + h*Wf + w.
                # Kernel flatten order: row = h*(Wf*Cf) + w*Cf + c.
                wl = jnp.transpose(w.reshape(out_f, Cf, Hf, Wf), (2, 3, 1, 0))
                wl = wl.reshape(in_f, out_f).astype(jnp.float32)
                flat_dims = None
            else:
                wl = w.T.astype(jnp.float32)
            prepared += [wl, b.reshape(1, out_f).astype(jnp.float32)]
        elif name == 'max_pool2d':
            k, s, p = param
            assert k == 2 and s == 2 and p == 0 and H % 2 == 0 and W % 2 == 0, \
                "TODO(synk): only 2x2 / stride-2 / no-pad max pooling supported"
            H, W = H // 2, W // 2
        elif name == 'flatten':
            flat_dims = (H, W, C)
        elif name == 'relu':
            pass
        else:
            # TODO(synk): tanh/sigmoid/leakyrelu/upsample/avg_pool2d/reshape not needed for
            # this config; add as in-kernel elementwise / pooling stages when required.
            raise NotImplementedError(name)
    assert idx == len(vars_)
    assert bn_idx == len(vars_bn)
    return prepared


# ----------------------------- in-kernel helpers (trace-time) --------------------------
def _sum_over_w(row, W, C):
    """(1, W*C) -> (1, C): sum of the W channel groups along the lane dim."""
    tot = row[:, 0:C]
    for w in range(1, W):
        tot = tot + row[:, w * C:(w + 1) * C]
    return tot


def _per_channel_to_lanes(v, W):
    """(1, C) -> (1, W*C) with lane = w*C + c (matches the activation layout)."""
    return jnp.concatenate([v] * W, axis=1) if W > 1 else v


# ----------------------------- fused forward kernel ------------------------------------
def make_kernel(config, N, H0, W0, C0, training):
    def kernel(*refs):
        x_ref, out_ref = refs[0], refs[-1]
        prefs = refs[1:-1]
        pi = 0
        act = x_ref[...]                        # (N*H0, W0*C0), lane index = w*C + c
        H, W, C = H0, W0, C0
        flat_dims = None
        for name, param in config:
            if name == 'conv2d':
                w_big_ref, b_lane_ref = prefs[pi], prefs[pi + 1]
                pi += 2
                cout, _cin, kh, kw, _stride, pad = param[:6]
                Hp, Wp = H + 2 * pad, W + 2 * pad
                Ho, Wo = Hp - kh + 1, Wp - kw + 1
                # zero-pad each image (stays in vregs/VMEM)
                imgs = []
                for n in range(N):
                    img = act[n * H:(n + 1) * H, :]
                    if pad:
                        zl = jnp.zeros((H, pad * C), jnp.float32)
                        img = jnp.concatenate([zl, img, zl], axis=1)
                        zr = jnp.zeros((pad, Wp * C), jnp.float32)
                        img = jnp.concatenate([zr, img, zr], axis=0)
                    imgs.append(img)
                xp = jnp.concatenate(imgs, axis=0) if N > 1 else imgs[0]      # (N*Hp, Wp*C)
                # patch matrix with lanes grouped [tap][w][ci] -> one lane-dense MXU matmul
                blocks = []
                for di in range(kh):
                    for dj in range(kw):
                        per_img = [xp[n * Hp + di:n * Hp + di + Ho, dj * C:dj * C + Wo * C]
                                   for n in range(N)]
                        blocks.append(jnp.concatenate(per_img, axis=0) if N > 1 else per_img[0])
                patches = jnp.concatenate(blocks, axis=1)                      # (N*Ho, kh*kw*Wo*C)
                act = (jnp.dot(patches, w_big_ref[...],
                               preferred_element_type=jnp.float32)
                       + b_lane_ref[...])                                      # (N*Ho, Wo*cout)
                H, W, C = Ho, Wo, cout
            elif name == 'bn':
                g = prefs[pi][...]
                bt = prefs[pi + 1][...]
                rm = prefs[pi + 2][...]
                rv = prefs[pi + 3][...]
                pi += 4
                if training:
                    inv_cnt = 1.0 / float(N * H * W)
                    mean_c = _sum_over_w(jnp.sum(act, axis=0, keepdims=True), W, C) * inv_cnt
                    ex2_c = _sum_over_w(jnp.sum(act * act, axis=0, keepdims=True), W, C) * inv_cnt
                    var_c = ex2_c - mean_c * mean_c
                    s_c = g * lax.rsqrt(var_c + _BN_EPS)        # per-channel scale
                    t_c = bt - mean_c * s_c                     # per-channel shift
                else:
                    # Running stats used exactly as stored by the reference module (which
                    # initializes running_var to zeros, per the spec).
                    s_c = g * lax.rsqrt(rv + _BN_EPS)
                    t_c = bt - rm * s_c
                act = act * _per_channel_to_lanes(s_c, W) + _per_channel_to_lanes(t_c, W)
            elif name == 'relu':
                act = jnp.maximum(act, 0.0)
            elif name == 'max_pool2d':
                Ho, Wo = H // 2, W // 2
                R, L = N * H, W * C
                # vertical pairs: row 2k of `pairmax` = max(row 2k, row 2k+1); image
                # boundaries are safe because every image spans an even number of rows.
                pairmax = jnp.maximum(act[0:R - 1, :], act[1:R, :])
                rows = [pairmax[2 * r:2 * r + 1, :] for r in range(N * Ho)]
                rmax = jnp.concatenate(rows, axis=0) if len(rows) > 1 else rows[0]   # (N*Ho, W*C)
                # horizontal pairs of channel groups
                cpair = jnp.maximum(rmax[:, 0:L - C], rmax[:, C:L])
                cols = [cpair[:, 2 * wo * C:(2 * wo + 1) * C] for wo in range(Wo)]
                act = jnp.concatenate(cols, axis=1) if len(cols) > 1 else cols[0]    # (N*Ho, Wo*C)
                H, W = Ho, Wo
            elif name == 'flatten':
                flat_dims = (H, W, C)
            elif name == 'linear':
                wl_ref, bl_ref = prefs[pi], prefs[pi + 1]
                pi += 2
                if flat_dims is not None:
                    Hf, Wf, Cf = flat_dims
                    # gather each sample's Hf rows into one lane-dense row -> single matmul
                    rows = []
                    for n in range(N):
                        segs = [act[n * Hf + h:n * Hf + h + 1, :] for h in range(Hf)]
                        rows.append(jnp.concatenate(segs, axis=1) if Hf > 1 else segs[0])
                    flat = jnp.concatenate(rows, axis=0) if N > 1 else rows[0]  # (N, Hf*Wf*Cf)
                    act = jnp.dot(flat, wl_ref[...],
                                  preferred_element_type=jnp.float32) + bl_ref[...]
                    flat_dims = None
                else:
                    act = jnp.dot(act, wl_ref[...],
                                  preferred_element_type=jnp.float32) + bl_ref[...]
            else:
                raise NotImplementedError(name)
        assert pi == len(prefs)
        out_ref[...] = act.astype(out_ref.dtype)

    return kernel


def fused_forward(x_nchw, prepared, *, config, training):
    N, C0, H0, W0 = x_nchw.shape
    # boundary relayout only: NCHW -> lane-dense [N*H, W*C]
    xw = jnp.transpose(x_nchw, (0, 2, 3, 1)).reshape(N * H0, W0 * C0).astype(jnp.float32)
    kernel = make_kernel(config, N, H0, W0, C0, training)
    out_f = _final_out_features(config)
    return pl.pallas_call(
        kernel,
        out_shape=jax.ShapeDtypeStruct((N, out_f), jnp.float32),
        in_specs=_vmem_specs(1 + len(prepared)),
        out_specs=pl.BlockSpec(memory_space=pltpu.MemorySpace.VMEM),
    )(xw, *prepared)


# ----------------------------- Learner (JAX/Pallas) ------------------------------------
class LearnerPallas:
    def __init__(self, config, key):
        self.config = config
        self.vars = []
        self.vars_bn = []
        for name, param in config:
            if name == 'conv2d':
                out_c, in_c, kh, kw = param[:4]
                key, sub = jax.random.split(key)
                fan_in = in_c * kh * kw
                w = jax.random.normal(sub, (out_c, in_c, kh, kw), jnp.float32) * jnp.sqrt(2.0 / fan_in)
                self.vars.append(w)                                  # kaiming_normal_-style
                self.vars.append(jnp.zeros((out_c,), jnp.float32))   # bias
            elif name == 'linear':
                out_f, in_f = param
                key, sub = jax.random.split(key)
                w = jax.random.normal(sub, (out_f, in_f), jnp.float32) * jnp.sqrt(2.0 / in_f)
                self.vars.append(w)
                self.vars.append(jnp.zeros((out_f,), jnp.float32))
            elif name == 'bn':
                c = param[0]
                self.vars.append(jnp.ones((c,), jnp.float32))
                self.vars.append(jnp.zeros((c,), jnp.float32))
                # running stats init to zeros, exactly like the reference module
                # TODO(synk): running stats are not momentum-updated (functional forward only)
                self.vars_bn.extend([jnp.zeros((c,), jnp.float32),
                                     jnp.zeros((c,), jnp.float32)])
            elif name in ['tanh', 'relu', 'upsample', 'avg_pool2d', 'max_pool2d',
                          'flatten', 'reshape', 'leakyrelu', 'sigmoid']:
                continue
            else:
                raise NotImplementedError(name)
        self._prep_cache = {}
        self._fwd_cache = {}

    def _get_fwd(self, training):
        if training not in self._fwd_cache:
            self._fwd_cache[training] = jax.jit(
                functools.partial(fused_forward, config=self.config, training=training))
        return self._fwd_cache[training]

    def __call__(self, x_nchw, vars=None, bn_training=True):
        N, C0, H0, W0 = x_nchw.shape
        if vars is None:
            ck = (H0, W0, C0)
            if ck not in self._prep_cache:
                self._prep_cache[ck] = prepare_params(self.config, self.vars, self.vars_bn,
                                                      H0, W0, C0)
            prepared = self._prep_cache[ck]
        else:
            prepared = prepare_params(self.config, vars, self.vars_bn, H0, W0, C0)
        return self._get_fwd(bool(bn_training))(x_nchw, tuple(prepared))


# ----------------------------- pure-JAX reference (NCHW, sanity check) -----------------
def ref_forward(x, config, vars_):
    idx = 0
    for name, param in config:
        if name == 'conv2d':
            w, b = vars_[idx], vars_[idx + 1]
            s, p = param[4], param[5]
            x = lax.conv_general_dilated(x, w, (s, s), [(p, p), (p, p)],
                                         dimension_numbers=('NCHW', 'OIHW', 'NCHW'))
            x = x + b[None, :, None, None]
            idx += 2
        elif name == 'linear':
            w, b = vars_[idx], vars_[idx + 1]
            x = x @ w.T + b
            idx += 2
        elif name == 'bn':
            g, bt = vars_[idx], vars_[idx + 1]
            mean = jnp.mean(x, axis=(0, 2, 3), keepdims=True)
            var = jnp.mean((x - mean) ** 2, axis=(0, 2, 3), keepdims=True)
            x = (x - mean) / jnp.sqrt(var + _BN_EPS) * g[None, :, None, None] + bt[None, :, None, None]
            idx += 2
        elif name == 'relu':
            x = jnp.maximum(x, 0.0)
        elif name == 'max_pool2d':
            k, s, p = param
            x = lax.reduce_window(x, -jnp.inf, lax.max, (1, 1, k, k), (1, 1, s, s),
                                  [(0, 0), (0, 0), (p, p), (p, p)])
        elif name == 'flatten':
            x = x.reshape(x.shape[0], -1)
    return x


# ----------------------------- main -----------------------------------------------------
if __name__ == "__main__":
    # MAML-style conv net config (out_ch, in_ch, kh, kw, stride, padding)
    config = [
        ('conv2d', [8, 4, 3, 3, 1, 1]),
        ('bn', [8]),
        ('relu', [True]),
        ('max_pool2d', [2, 2, 0]),
        ('conv2d', [8, 8, 3, 3, 1, 1]),
        ('bn', [8]),
        ('relu', [True]),
        ('max_pool2d', [2, 2, 0]),
        ('flatten', []),
        ('linear', [10, 8 * 4 * 4]),
    ]

    key = jax.random.PRNGKey(0)
    key, xkey = jax.random.split(key)
    x = jax.random.normal(xkey, (2, 4, 16, 16), jnp.float32)   # NCHW like torch

    model = LearnerPallas(config, key)
    out = model(x, bn_training=True)
    jax.block_until_ready(out)
    assert out.shape == (2, 10)

    ref = ref_forward(x, config, model.vars)
    np.testing.assert_allclose(np.asarray(out), np.asarray(ref), rtol=1e-2, atol=1e-2)

    print("KERNEL_OK")
</pallas_src>

<mosaic_0001>
module attributes {stable_mosaic.version = 11 : i64} {
  func.func @kernel(%arg0: memref<32x64xf32, #tpu.memory_space<vmem>>, %arg1: memref<576x128xf32, #tpu.memory_space<vmem>>, %arg2: memref<1x128xf32, #tpu.memory_space<vmem>>, %arg3: memref<1x8xf32, #tpu.memory_space<vmem>>, %arg4: memref<1x8xf32, #tpu.memory_space<vmem>>, %arg5: memref<1x8xf32, #tpu.memory_space<vmem>>, %arg6: memref<1x8xf32, #tpu.memory_space<vmem>>, %arg7: memref<576x64xf32, #tpu.memory_space<vmem>>, %arg8: memref<1x64xf32, #tpu.memory_space<vmem>>, %arg9: memref<1x8xf32, #tpu.memory_space<vmem>>, %arg10: memref<1x8xf32, #tpu.memory_space<vmem>>, %arg11: memref<1x8xf32, #tpu.memory_space<vmem>>, %arg12: memref<1x8xf32, #tpu.memory_space<vmem>>, %arg13: memref<128x10xf32, #tpu.memory_space<vmem>>, %arg14: memref<1x10xf32, #tpu.memory_space<vmem>>, %arg15: memref<2x10xf32, #tpu.memory_space<vmem>>) attributes {dimension_semantics = [], scalar_prefetch = 0 : i64, scratch_operands = 0 : i64, tpu.core_type = #tpu.core_type<tc>} {
    %c0 = arith.constant 0 : index
    %c0_0 = arith.constant 0 : index
    %0 = vector.load %arg0[%c0, %c0_0] : memref<32x64xf32, #tpu.memory_space<vmem>>, vector<32x64xf32>
    %1 = vector.extract_strided_slice %0 {offsets = [0, 0], sizes = [16, 64], strides = [1, 1]} : vector<32x64xf32> to vector<16x64xf32>
    %cst = arith.constant 0.000000e+00 : f32
    %2 = vector.broadcast %cst : f32 to vector<16x4xf32>
    %3 = tpu.concatenate %2, %1, %2 in 1 : vector<16x4xf32>, vector<16x64xf32>, vector<16x4xf32> -> vector<16x72xf32>
    %cst_1 = arith.constant 0.000000e+00 : f32
    %4 = vector.broadcast %cst_1 : f32 to vector<1x72xf32>
    %5 = tpu.concatenate %4, %3, %4 in 0 : vector<1x72xf32>, vector<16x72xf32>, vector<1x72xf32> -> vector<18x72xf32>
    %6 = vector.extract_strided_slice %0 {offsets = [16, 0], sizes = [16, 64], strides = [1, 1]} : vector<32x64xf32> to vector<16x64xf32>
    %cst_2 = arith.constant 0.000000e+00 : f32
    %7 = vector.broadcast %cst_2 : f32 to vector<16x4xf32>
    %8 = tpu.concatenate %7, %6, %7 in 1 : vector<16x4xf32>, vector<16x64xf32>, vector<16x4xf32> -> vector<16x72xf32>
    %cst_3 = arith.constant 0.000000e+00 : f32
    %9 = vector.broadcast %cst_3 : f32 to vector<1x72xf32>
    %10 = tpu.concatenate %9, %8, %9 in 0 : vector<1x72xf32>, vector<16x72xf32>, vector<1x72xf32> -> vector<18x72xf32>
    %11 = tpu.concatenate %5, %10 in 0 : vector<18x72xf32>, vector<18x72xf32> -> vector<36x72xf32>
    %12 = vector.extract_strided_slice %11 {offsets = [0, 0], sizes = [16, 64], strides = [1, 1]} : vector<36x72xf32> to vector<16x64xf32>
    %13 = vector.extract_strided_slice %11 {offsets = [18, 0], sizes = [16, 64], strides = [1, 1]} : vector<36x72xf32> to vector<16x64xf32>
    %14 = tpu.concatenate %12, %13 in 0 : vector<16x64xf32>, vector<16x64xf32> -> vector<32x64xf32>
    %15 = vector.extract_strided_slice %11 {offsets = [0, 4], sizes = [16, 64], strides = [1, 1]} : vector<36x72xf32> to vector<16x64xf32>
    %16 = vector.extract_strided_slice %11 {offsets = [18, 4], sizes = [16, 64], strides = [1, 1]} : vector<36x72xf32> to vector<16x64xf32>
    %17 = tpu.concatenate %15, %16 in 0 : vector<16x64xf32>, vector<16x64xf32> -> vector<32x64xf32>
    %18 = vector.extract_strided_slice %11 {offsets = [0, 8], sizes = [16, 64], strides = [1, 1]} : vector<36x72xf32> to vector<16x64xf32>
    %19 = vector.extract_strided_slice %11 {offsets = [18, 8], sizes = [16, 64], strides = [1, 1]} : vector<36x72xf32> to vector<16x64xf32>
    %20 = tpu.concatenate %18, %19 in 0 : vector<16x64xf32>, vector<16x64xf32> -> vector<32x64xf32>
    %21 = vector.extract_strided_slice %11 {offsets = [1, 0], sizes = [16, 64], strides = [1, 1]} : vector<36x72xf32> to vector<16x64xf32>
    %22 = vector.extract_strided_slice %11 {offsets = [19, 0], sizes = [16, 64], strides = [1, 1]} : vector<36x72xf32> to vector<16x64xf32>
    %23 = tpu.concatenate %21, %22 in 0 : vector<16x64xf32>, vector<16x64xf32> -> vector<32x64xf32>
    %24 = vector.extract_strided_slice %11 {offsets = [1, 4], sizes = [16, 64], strides = [1, 1]} : vector<36x72xf32> to vector<16x64xf32>
    %25 = vector.extract_strided_slice %11 {offsets = [19, 4], sizes = [16, 64], strides = [1, 1]} : vector<36x72xf32> to vector<16x64xf32>
    %26 = tpu.concatenate %24, %25 in 0 : vector<16x64xf32>, vector<16x64xf32> -> vector<32x64xf32>
    %27 = vector.extract_strided_slice %11 {offsets = [1, 8], sizes = [16, 64], strides = [1, 1]} : vector<36x72xf32> to vector<16x64xf32>
    %28 = vector.extract_strided_slice %11 {offsets = [19, 8], sizes = [16, 64], strides = [1, 1]} : vector<36x72xf32> to vector<16x64xf32>
    %29 = tpu.concatenate %27, %28 in 0 : vector<16x64xf32>, vector<16x64xf32> -> vector<32x64xf32>
    %30 = vector.extract_strided_slice %11 {offsets = [2, 0], sizes = [16, 64], strides = [1, 1]} : vector<36x72xf32> to vector<16x64xf32>
    %31 = vector.extract_strided_slice %11 {offsets = [20, 0], sizes = [16, 64], strides = [1, 1]} : vector<36x72xf32> to vector<16x64xf32>
    %32 = tpu.concatenate %30, %31 in 0 : vector<16x64xf32>, vector<16x64xf32> -> vector<32x64xf32>
    %33 = vector.extract_strided_slice %11 {offsets = [2, 4], sizes = [16, 64], strides = [1, 1]} : vector<36x72xf32> to vector<16x64xf32>
    %34 = vector.extract_strided_slice %11 {offsets = [20, 4], sizes = [16, 64], strides = [1, 1]} : vector<36x72xf32> to vector<16x64xf32>
    %35 = tpu.concatenate %33, %34 in 0 : vector<16x64xf32>, vector<16x64xf32> -> vector<32x64xf32>
    %36 = vector.extract_strided_slice %11 {offsets = [2, 8], sizes = [16, 64], strides = [1, 1]} : vector<36x72xf32> to vector<16x64xf32>
    %37 = vector.extract_strided_slice %11 {offsets = [20, 8], sizes = [16, 64], strides = [1, 1]} : vector<36x72xf32> to vector<16x64xf32>
    %38 = tpu.concatenate %36, %37 in 0 : vector<16x64xf32>, vector<16x64xf32> -> vector<32x64xf32>
    %39 = tpu.concatenate %14, %17, %20, %23, %26, %29, %32, %35, %38 in 1 : vector<32x64xf32>, vector<32x64xf32>, vector<32x64xf32>, vector<32x64xf32>, vector<32x64xf32>, vector<32x64xf32>, vector<32x64xf32>, vector<32x64xf32>, vector<32x64xf32> -> vector<32x576xf32>
    %c0_4 = arith.constant 0 : index
    %c0_5 = arith.constant 0 : index
    %40 = vector.load %arg1[%c0_4, %c0_5] : memref<576x128xf32, #tpu.memory_space<vmem>>, vector<576x128xf32>
    %cst_6 = arith.constant dense<0.000000e+00> : vector<32x128xf32>
    %41 = tpu.matmul %39, %40, %cst_6 {dimension_numbers = #tpu.dot_dimension_numbers<[1], [0], [0], [1], [0, 0, 1, 1], [], []>} : vector<32x576xf32>, vector<576x128xf32>, vector<32x128xf32> -> vector<32x128xf32>
    %c0_7 = arith.constant 0 : index
    %c0_8 = arith.constant 0 : index
    %42 = vector.load %arg2[%c0_7, %c0_8] : memref<1x128xf32, #tpu.memory_space<vmem>>, vector<1x128xf32>
    %43 = vector.broadcast %42 : vector<1x128xf32> to vector<32x128xf32>
    %44 = arith.addf %41, %43 : vector<32x128xf32>
    %c0_9 = arith.constant 0 : index
    %c0_10 = arith.constant 0 : index
    %45 = vector.load %arg3[%c0_9, %c0_10] : memref<1x8xf32, #tpu.memory_space<vmem>>, vector<1x8xf32>
    %c0_11 = arith.constant 0 : index
    %c0_12 = arith.constant 0 : index
    %46 = vector.load %arg4[%c0_11, %c0_12] : memref<1x8xf32, #tpu.memory_space<vmem>>, vector<1x8xf32>
    %cst_13 = arith.constant dense<0.000000e+00> : vector<128xf32>
    %47 = vector.multi_reduction <add>, %44, %cst_13 [0] : vector<32x128xf32> to vector<128xf32>
    %48 = vector.shape_cast %47 : vector<128xf32> to vector<1x128xf32>
    %49 = vector.extract_strided_slice %48 {offsets = [0, 0], sizes = [1, 8], strides = [1, 1]} : vector<1x128xf32> to vector<1x8xf32>
    %50 = vector.extract_strided_slice %48 {offsets = [0, 8], sizes = [1, 8], strides = [1, 1]} : vector<1x128xf32> to vector<1x8xf32>
    %51 = arith.addf %49, %50 : vector<1x8xf32>
    %52 = vector.extract_strided_slice %48 {offsets = [0, 16], sizes = [1, 8], strides = [1, 1]} : vector<1x128xf32> to vector<1x8xf32>
    %53 = arith.addf %51, %52 : vector<1x8xf32>
    %54 = vector.extract_strided_slice %48 {offsets = [0, 24], sizes = [1, 8], strides = [1, 1]} : vector<1x128xf32> to vector<1x8xf32>
    %55 = arith.addf %53, %54 : vector<1x8xf32>
    %56 = vector.extract_strided_slice %48 {offsets = [0, 32], sizes = [1, 8], strides = [1, 1]} : vector<1x128xf32> to vector<1x8xf32>
    %57 = arith.addf %55, %56 : vector<1x8xf32>
    %58 = vector.extract_strided_slice %48 {offsets = [0, 40], sizes = [1, 8], strides = [1, 1]} : vector<1x128xf32> to vector<1x8xf32>
    %59 = arith.addf %57, %58 : vector<1x8xf32>
    %60 = vector.extract_strided_slice %48 {offsets = [0, 48], sizes = [1, 8], strides = [1, 1]} : vector<1x128xf32> to vector<1x8xf32>
    %61 = arith.addf %59, %60 : vector<1x8xf32>
    %62 = vector.extract_strided_slice %48 {offsets = [0, 56], sizes = [1, 8], strides = [1, 1]} : vector<1x128xf32> to vector<1x8xf32>
    %63 = arith.addf %61, %62 : vector<1x8xf32>
    %64 = vector.extract_strided_slice %48 {offsets = [0, 64], sizes = [1, 8], strides = [1, 1]} : vector<1x128xf32> to vector<1x8xf32>
    %65 = arith.addf %63, %64 : vector<1x8xf32>
    %66 = vector.extract_strided_slice %48 {offsets = [0, 72], sizes = [1, 8], strides = [1, 1]} : vector<1x128xf32> to vector<1x8xf32>
    %67 = arith.addf %65, %66 : vector<1x8xf32>
    %68 = vector.extract_strided_slice %48 {offsets = [0, 80], sizes = [1, 8], strides = [1, 1]} : vector<1x128xf32> to vector<1x8xf32>
    %69 = arith.addf %67, %68 : vector<1x8xf32>
    %70 = vector.extract_strided_slice %48 {offsets = [0, 88], sizes = [1, 8], strides = [1, 1]} : vector<1x128xf32> to vector<1x8xf32>
    %71 = arith.addf %69, %70 : vector<1x8xf32>
    %72 = vector.extract_strided_slice %48 {offsets = [0, 96], sizes = [1, 8], strides = [1, 1]} : vector<1x128xf32> to vector<1x8xf32>
    %73 = arith.addf %71, %72 : vector<1x8xf32>
    %74 = vector.extract_strided_slice %48 {offsets = [0, 104], sizes = [1, 8], strides = [1, 1]} : vector<1x128xf32> to vector<1x8xf32>
    %75 = arith.addf %73, %74 : vector<1x8xf32>
    %76 = vector.extract_strided_slice %48 {offsets = [0, 112], sizes = [1, 8], strides = [1, 1]} : vector<1x128xf32> to vector<1x8xf32>
    %77 = arith.addf %75, %76 : vector<1x8xf32>
    %78 = vector.extract_strided_slice %48 {offsets = [0, 120], sizes = [1, 8], strides = [1, 1]} : vector<1x128xf32> to vector<1x8xf32>
    %79 = arith.addf %77, %78 : vector<1x8xf32>
    %cst_14 = arith.constant 0.001953125 : f32
    %80 = vector.broadcast %cst_14 : f32 to vector<1x8xf32>
    %81 = arith.mulf %79, %80 : vector<1x8xf32>
    %82 = arith.mulf %44, %44 : vector<32x128xf32>
    %cst_15 = arith.constant dense<0.000000e+00> : vector<128xf32>
    %83 = vector.multi_reduction <add>, %82, %cst_15 [0] : vector<32x128xf32> to vector<128xf32>
    %84 = vector.shape_cast %83 : vector<128xf32> to vector<1x128xf32>
    %85 = vector.extract_strided_slice %84 {offsets = [0, 0], sizes = [1, 8], strides = [1, 1]} : vector<1x128xf32> to vector<1x8xf32>
    %86 = vector.extract_strided_slice %84 {offsets = [0, 8], sizes = [1, 8], strides = [1, 1]} : vector<1x128xf32> to vector<1x8xf32>
    %87 = arith.addf %85, %86 : vector<1x8xf32>
    %88 = vector.extract_strided_slice %84 {offsets = [0, 16], sizes = [1, 8], strides = [1, 1]} : vector<1x128xf32> to vector<1x8xf32>
    %89 = arith.addf %87, %88 : vector<1x8xf32>
    %90 = vector.extract_strided_slice %84 {offsets = [0, 24], sizes = [1, 8], strides = [1, 1]} : vector<1x128xf32> to vector<1x8xf32>
    %91 = arith.addf %89, %90 : vector<1x8xf32>
    %92 = vector.extract_strided_slice %84 {offsets = [0, 32], sizes = [1, 8], strides = [1, 1]} : vector<1x128xf32> to vector<1x8xf32>
    %93 = arith.addf %91, %92 : vector<1x8xf32>
    %94 = vector.extract_strided_slice %84 {offsets = [0, 40], sizes = [1, 8], strides = [1, 1]} : vector<1x128xf32> to vector<1x8xf32>
    %95 = arith.addf %93, %94 : vector<1x8xf32>
    %96 = vector.extract_strided_slice %84 {offsets = [0, 48], sizes = [1, 8], strides = [1, 1]} : vector<1x128xf32> to vector<1x8xf32>
    %97 = arith.addf %95, %96 : vector<1x8xf32>
    %98 = vector.extract_strided_slice %84 {offsets = [0, 56], sizes = [1, 8], strides = [1, 1]} : vector<1x128xf32> to vector<1x8xf32>
    %99 = arith.addf %97, %98 : vector<1x8xf32>
    %100 = vector.extract_strided_slice %84 {offsets = [0, 64], sizes = [1, 8], strides = [1, 1]} : vector<1x128xf32> to vector<1x8xf32>
    %101 = arith.addf %99, %100 : vector<1x8xf32>
    %102 = vector.extract_strided_slice %84 {offsets = [0, 72], sizes = [1, 8], strides = [1, 1]} : vector<1x128xf32> to vector<1x8xf32>
    %103 = arith.addf %101, %102 : vector<1x8xf32>
    %104 = vector.extract_strided_slice %84 {offsets = [0, 80], sizes = [1, 8], strides = [1, 1]} : vector<1x128xf32> to vector<1x8xf32>
    %105 = arith.addf %103, %104 : vector<1x8xf32>
    %106 = vector.extract_strided_slice %84 {offsets = [0, 88], sizes = [1, 8], strides = [1, 1]} : vector<1x128xf32> to vector<1x8xf32>
    %107 = arith.addf %105, %106 : vector<1x8xf32>
    %108 = vector.extract_strided_slice %84 {offsets = [0, 96], sizes = [1, 8], strides = [1, 1]} : vector<1x128xf32> to vector<1x8xf32>
    %109 = arith.addf %107, %108 : vector<1x8xf32>
    %110 = vector.extract_strided_slice %84 {offsets = [0, 104], sizes = [1, 8], strides = [1, 1]} : vector<1x128xf32> to vector<1x8xf32>
    %111 = arith.addf %109, %110 : vector<1x8xf32>
    %112 = vector.extract_strided_slice %84 {offsets = [0, 112], sizes = [1, 8], strides = [1, 1]} : vector<1x128xf32> to vector<1x8xf32>
    %113 = arith.addf %111, %112 : vector<1x8xf32>
    %114 = vector.extract_strided_slice %84 {offsets = [0, 120], sizes = [1, 8], strides = [1, 1]} : vector<1x128xf32> to vector<1x8xf32>
    %115 = arith.addf %113, %114 : vector<1x8xf32>
    %cst_16 = arith.constant 0.001953125 : f32
    %116 = vector.broadcast %cst_16 : f32 to vector<1x8xf32>
    %117 = arith.mulf %115, %116 : vector<1x8xf32>
    %118 = arith.mulf %81, %81 : vector<1x8xf32>
    %119 = arith.subf %117, %118 : vector<1x8xf32>
    %cst_17 = arith.constant 9.99999974E-6 : f32
    %120 = vector.broadcast %cst_17 : f32 to vector<1x8xf32>
    %121 = arith.addf %119, %120 : vector<1x8xf32>
    %122 = math.rsqrt %121 : vector<1x8xf32>
    %123 = arith.mulf %45, %122 : vector<1x8xf32>
    %124 = arith.mulf %81, %123 : vector<1x8xf32>
    %125 = arith.subf %46, %124 : vector<1x8xf32>
    %126 = tpu.concatenate %123, %123, %123, %123, %123, %123, %123, %123, %123, %123, %123, %123, %123, %123, %123, %123 in 1 : vector<1x8xf32>, vector<1x8xf32>, vector<1x8xf32>, vector<1x8xf32>, vector<1x8xf32>, vector<1x8xf32>, vector<1x8xf32>, vector<1x8xf32>, vector<1x8xf32>, vector<1x8xf32>, vector<1x8xf32>, vector<1x8xf32>, vector<1x8xf32>, vector<1x8xf32>, vector<1x8xf32>, vector<1x8xf32> -> vector<1x128xf32>
    %127 = vector.broadcast %126 : vector<1x128xf32> to vector<32x128xf32>
    %128 = arith.mulf %44, %127 : vector<32x128xf32>
    %129 = tpu.concatenate %125, %125, %125, %125, %125, %125, %125, %125, %125, %125, %125, %125, %125, %125, %125, %125 in 1 : vector<1x8xf32>, vector<1x8xf32>, vector<1x8xf32>, vector<1x8xf32>, vector<1x8xf32>, vector<1x8xf32>, vector<1x8xf32>, vector<1x8xf32>, vector<1x8xf32>, vector<1x8xf32>, vector<1x8xf32>, vector<1x8xf32>, vector<1x8xf32>, vector<1x8xf32>, vector<1x8xf32>, vector<1x8xf32> -> vector<1x128xf32>
    %130 = vector.broadcast %129 : vector<1x128xf32> to vector<32x128xf32>
    %131 = arith.addf %128, %130 : vector<32x128xf32>
    %cst_18 = arith.constant 0.000000e+00 : f32
    %132 = vector.broadcast %cst_18 : f32 to vector<32x128xf32>
    %133 = arith.maximumf %131, %132 : vector<32x128xf32>
    %134 = vector.extract_strided_slice %133 {offsets = [0, 0], sizes = [31, 128], strides = [1, 1]} : vector<32x128xf32> to vector<31x128xf32>
    %135 = vector.extract_strided_slice %133 {offsets = [1, 0], sizes = [31, 128], strides = [1, 1]} : vector<32x128xf32> to vector<31x128xf32>
    %136 = arith.maximumf %134, %135 : vector<31x128xf32>
    %137 = vector.extract_strided_slice %136 {offsets = [0, 0], sizes = [1, 128], strides = [1, 1]} : vector<31x128xf32> to vector<1x128xf32>
    %138 = vector.extract_strided_slice %136 {offsets = [2, 0], sizes = [1, 128], strides = [1, 1]} : vector<31x128xf32> to vector<1x128xf32>
    %139 = vector.extract_strided_slice %136 {offsets = [4, 0], sizes = [1, 128], strides = [1, 1]} : vector<31x128xf32> to vector<1x128xf32>
    %140 = vector.extract_strided_slice %136 {offsets = [6, 0], sizes = [1, 128], strides = [1, 1]} : vector<31x128xf32> to vector<1x128xf32>
    %141 = vector.extract_strided_slice %136 {offsets = [8, 0], sizes = [1, 128], strides = [1, 1]} : vector<31x128xf32> to vector<1x128xf32>
    %142 = vector.extract_strided_slice %136 {offsets = [10, 0], sizes = [1, 128], strides = [1, 1]} : vector<31x128xf32> to vector<1x128xf32>
    %143 = vector.extract_strided_slice %136 {offsets = [12, 0], sizes = [1, 128], strides = [1, 1]} : vector<31x128xf32> to vector<1x128xf32>
    %144 = vector.extract_strided_slice %136 {offsets = [14, 0], sizes = [1, 128], strides = [1, 1]} : vector<31x128xf32> to vector<1x128xf32>
    %145 = vector.extract_strided_slice %136 {offsets = [16, 0], sizes = [1, 128], strides = [1, 1]} : vector<31x128xf32> to vector<1x128xf32>
    %146 = vector.extract_strided_slice %136 {offsets = [18, 0], sizes = [1, 128], strides = [1, 1]} : vector<31x128xf32> to vector<1x128xf32>
    %147 = vector.extract_strided_slice %136 {offsets = [20, 0], sizes = [1, 128], strides = [1, 1]} : vector<31x128xf32> to vector<1x128xf32>
    %148 = vector.extract_strided_slice %136 {offsets = [22, 0], sizes = [1, 128], strides = [1, 1]} : vector<31x128xf32> to vector<1x128xf32>
    %149 = vector.extract_strided_slice %136 {offsets = [24, 0], sizes = [1, 128], strides = [1, 1]} : vector<31x128xf32> to vector<1x128xf32>
    %150 = vector.extract_strided_slice %136 {offsets = [26, 0], sizes = [1, 128], strides = [1, 1]} : vector<31x128xf32> to vector<1x128xf32>
    %151 = vector.extract_strided_slice %136 {offsets = [28, 0], sizes = [1, 128], strides = [1, 1]} : vector<31x128xf32> to vector<1x128xf32>
    %152 = vector.extract_strided_slice %136 {offsets = [30, 0], sizes = [1, 128], strides = [1, 1]} : vector<31x128xf32> to vector<1x128xf32>
    %153 = tpu.concatenate %137, %138, %139, %140, %141, %142, %143, %144, %145, %146, %147, %148, %149, %150, %151, %152 in 0 : vector<1x128xf32>, vector<1x128xf32>, vector<1x128xf32>, vector<1x128xf32>, vector<1x128xf32>, vector<1x128xf32>, vector<1x128xf32>, vector<1x128xf32>, vector<1x128xf32>, vector<1x128xf32>, vector<1x128xf32>, vector<1x128xf32>, vector<1x128xf32>, vector<1x128xf32>, vector<1x128xf32>, vector<1x128xf32> -> vector<16x128xf32>
    %154 = vector.extract_strided_slice %153 {offsets = [0, 0], sizes = [16, 120], strides = [1, 1]} : vector<16x128xf32> to vector<16x120xf32>
    %155 = vector.extract_strided_slice %153 {offsets = [0, 8], sizes = [16, 120], strides = [1, 1]} : vector<16x128xf32> to vector<16x120xf32>
    %156 = arith.maximumf %154, %155 : vector<16x120xf32>
    %157 = vector.extract_strided_slice %156 {offsets = [0, 0], sizes = [16, 8], strides = [1, 1]} : vector<16x120xf32> to vector<16x8xf32>
    %158 = vector.extract_strided_slice %156 {offsets = [0, 16], sizes = [16, 8], strides = [1, 1]} : vector<16x120xf32> to vector<16x8xf32>
    %159 = vector.extract_strided_slice %156 {offsets = [0, 32], sizes = [16, 8], strides = [1, 1]} : vector<16x120xf32> to vector<16x8xf32>
    %160 = vector.extract_strided_slice %156 {offsets = [0, 48], sizes = [16, 8], strides = [1, 1]} : vector<16x120xf32> to vector<16x8xf32>
    %161 = vector.extract_strided_slice %156 {offsets = [0, 64], sizes = [16, 8], strides = [1, 1]} : vector<16x120xf32> to vector<16x8xf32>
    %162 = vector.extract_strided_slice %156 {offsets = [0, 80], sizes = [16, 8], strides = [1, 1]} : vector<16x120xf32> to vector<16x8xf32>
    %163 = vector.extract_strided_slice %156 {offsets = [0, 96], sizes = [16, 8], strides = [1, 1]} : vector<16x120xf32> to vector<16x8xf32>
    %164 = vector.extract_strided_slice %156 {offsets = [0, 112], sizes = [16, 8], strides = [1, 1]} : vector<16x120xf32> to vector<16x8xf32>
    %165 = tpu.concatenate %157, %158, %159, %160, %161, %162, %163, %164 in 1 : vector<16x8xf32>, vector<16x8xf32>, vector<16x8xf32>, vector<16x8xf32>, vector<16x8xf32>, vector<16x8xf32>, vector<16x8xf32>, vector<16x8xf32> -> vector<16x64xf32>
    %166 = vector.extract_strided_slice %165 {offsets = [0, 0], sizes = [8, 64], strides = [1, 1]} : vector<16x64xf32> to vector<8x64xf32>
    %cst_19 = arith.constant 0.000000e+00 : f32
    %167 = vector.broadcast %cst_19 : f32 to vector<8x8xf32>
    %168 = tpu.concatenate %167, %166, %167 in 1 : vector<8x8xf32>, vector<8x64xf32>, vector<8x8xf32> -> vector<8x80xf32>
    %cst_20 = arith.constant 0.000000e+00 : f32
    %169 = vector.broadcast %cst_20 : f32 to vector<1x80xf32>
    %170 = tpu.concatenate %169, %168, %169 in 0 : vector<1x80xf32>, vector<8x80xf32>, vector<1x80xf32> -> vector<10x80xf32>
    %171 = vector.extract_strided_slice %165 {offsets = [8, 0], sizes = [8, 64], strides = [1, 1]} : vector<16x64xf32> to vector<8x64xf32>
    %cst_21 = arith.constant 0.000000e+00 : f32
    %172 = vector.broadcast %cst_21 : f32 to vector<8x8xf32>
    %173 = tpu.concatenate %172, %171, %172 in 1 : vector<8x8xf32>, vector<8x64xf32>, vector<8x8xf32> -> vector<8x80xf32>
    %cst_22 = arith.constant 0.000000e+00 : f32
    %174 = vector.broadcast %cst_22 : f32 to vector<1x80xf32>
    %175 = tpu.concatenate %174, %173, %174 in 0 : vector<1x80xf32>, vector<8x80xf32>, vector<1x80xf32> -> vector<10x80xf32>
    %176 = tpu.concatenate %170, %175 in 0 : vector<10x80xf32>, vector<10x80xf32> -> vector<20x80xf32>
    %177 = vector.extract_strided_slice %176 {offsets = [0, 0], sizes = [8, 64], strides = [1, 1]} : vector<20x80xf32> to vector<8x64xf32>
    %178 = vector.extract_strided_slice %176 {offsets = [10, 0], sizes = [8, 64], strides = [1, 1]} : vector<20x80xf32> to vector<8x64xf32>
    %179 = tpu.concatenate %177, %178 in 0 : vector<8x64xf32>, vector<8x64xf32> -> vector<16x64xf32>
    %180 = vector.extract_strided_slice %176 {offsets = [0, 8], sizes = [8, 64], strides = [1, 1]} : vector<20x80xf32> to vector<8x64xf32>
    %181 = vector.extract_strided_slice %176 {offsets = [10, 8], sizes = [8, 64], strides = [1, 1]} : vector<20x80xf32> to vector<8x64xf32>
    %182 = tpu.concatenate %180, %181 in 0 : vector<8x64xf32>, vector<8x64xf32> -> vector<16x64xf32>
    %183 = vector.extract_strided_slice %176 {offsets = [0, 16], sizes = [8, 64], strides = [1, 1]} : vector<20x80xf32> to vector<8x64xf32>
    %184 = vector.extract_strided_slice %176 {offsets = [10, 16], sizes = [8, 64], strides = [1, 1]} : vector<20x80xf32> to vector<8x64xf32>
    %185 = tpu.concatenate %183, %184 in 0 : vector<8x64xf32>, vector<8x64xf32> -> vector<16x64xf32>
    %186 = vector.extract_strided_slice %176 {offsets = [1, 0], sizes = [8, 64], strides = [1, 1]} : vector<20x80xf32> to vector<8x64xf32>
    %187 = vector.extract_strided_slice %176 {offsets = [11, 0], sizes = [8, 64], strides = [1, 1]} : vector<20x80xf32> to vector<8x64xf32>
    %188 = tpu.concatenate %186, %187 in 0 : vector<8x64xf32>, vector<8x64xf32> -> vector<16x64xf32>
    %189 = vector.extract_strided_slice %176 {offsets = [1, 8], sizes = [8, 64], strides = [1, 1]} : vector<20x80xf32> to vector<8x64xf32>
    %190 = vector.extract_strided_slice %176 {offsets = [11, 8], sizes = [8, 64], strides = [1, 1]} : vector<20x80xf32> to vector<8x64xf32>
    %191 = tpu.concatenate %189, %190 in 0 : vector<8x64xf32>, vector<8x64xf32> -> vector<16x64xf32>
    %192 = vector.extract_strided_slice %176 {offsets = [1, 16], sizes = [8, 64], strides = [1, 1]} : vector<20x80xf32> to vector<8x64xf32>
    %193 = vector.extract_strided_slice %176 {offsets = [11, 16], sizes = [8, 64], strides = [1, 1]} : vector<20x80xf32> to vector<8x64xf32>
    %194 = tpu.concatenate %192, %193 in 0 : vector<8x64xf32>, vector<8x64xf32> -> vector<16x64xf32>
    %195 = vector.extract_strided_slice %176 {offsets = [2, 0], sizes = [8, 64], strides = [1, 1]} : vector<20x80xf32> to vector<8x64xf32>
    %196 = vector.extract_strided_slice %176 {offsets = [12, 0], sizes = [8, 64], strides = [1, 1]} : vector<20x80xf32> to vector<8x64xf32>
    %197 = tpu.concatenate %195, %196 in 0 : vector<8x64xf32>, vector<8x64xf32> -> vector<16x64xf32>
    %198 = vector.extract_strided_slice %176 {offsets = [2, 8], sizes = [8, 64], strides = [1, 1]} : vector<20x80xf32> to vector<8x64xf32>
    %199 = vector.extract_strided_slice %176 {offsets = [12, 8], sizes = [8, 64], strides = [1, 1]} : vector<20x80xf32> to vector<8x64xf32>
    %200 = tpu.concatenate %198, %199 in 0 : vector<8x64xf32>, vector<8x64xf32> -> vector<16x64xf32>
    %201 = vector.extract_strided_slice %176 {offsets = [2, 16], sizes = [8, 64], strides = [1, 1]} : vector<20x80xf32> to vector<8x64xf32>
    %202 = vector.extract_strided_slice %176 {offsets = [12, 16], sizes = [8, 64], strides = [1, 1]} : vector<20x80xf32> to vector<8x64xf32>
    %203 = tpu.concatenate %201, %202 in 0 : vector<8x64xf32>, vector<8x64xf32> -> vector<16x64xf32>
    %204 = tpu.concatenate %179, %182, %185, %188, %191, %194, %197, %200, %203 in 1 : vector<16x64xf32>, vector<16x64xf32>, vector<16x64xf32>, vector<16x64xf32>, vector<16x64xf32>, vector<16x64xf32>, vector<16x64xf32>, vector<16x64xf32>, vector<16x64xf32> -> vector<16x576xf32>
    %c0_23 = arith.constant 0 : index
    %c0_24 = arith.constant 0 : index
    %205 = vector.load %arg7[%c0_23, %c0_24] : memref<576x64xf32, #tpu.memory_space<vmem>>, vector<576x64xf32>
    %cst_25 = arith.constant dense<0.000000e+00> : vector<16x64xf32>
    %206 = tpu.matmul %204, %205, %cst_25 {dimension_numbers = #tpu.dot_dimension_numbers<[1], [0], [0], [1], [0, 0, 1, 1], [], []>} : vector<16x576xf32>, vector<576x64xf32>, vector<16x64xf32> -> vector<16x64xf32>
    %c0_26 = arith.constant 0 : index
    %c0_27 = arith.constant 0 : index
    %207 = vector.load %arg8[%c0_26, %c0_27] : memref<1x64xf32, #tpu.memory_space<vmem>>, vector<1x64xf32>
    %208 = vector.broadcast %207 : vector<1x64xf32> to vector<16x64xf32>
    %209 = arith.addf %206, %208 : vector<16x64xf32>
    %c0_28 = arith.constant 0 : index
    %c0_29 = arith.constant 0 : index
    %210 = vector.load %arg9[%c0_28, %c0_29] : memref<1x8xf32, #tpu.memory_space<vmem>>, vector<1x8xf32>
    %c0_30 = arith.constant 0 : index
    %c0_31 = arith.constant 0 : index
    %211 = vector.load %arg10[%c0_30, %c0_31] : memref<1x8xf32, #tpu.memory_space<vmem>>, vector<1x8xf32>
    %cst_32 = arith.constant dense<0.000000e+00> : vector<64xf32>
    %212 = vector.multi_reduction <add>, %209, %cst_32 [0] : vector<16x64xf32> to vector<64xf32>
    %213 = vector.shape_cast %212 : vector<64xf32> to vector<1x64xf32>
    %214 = vector.extract_strided_slice %213 {offsets = [0, 0], sizes = [1, 8], strides = [1, 1]} : vector<1x64xf32> to vector<1x8xf32>
    %215 = vector.extract_strided_slice %213 {offsets = [0, 8], sizes = [1, 8], strides = [1, 1]} : vector<1x64xf32> to vector<1x8xf32>
    %216 = arith.addf %214, %215 : vector<1x8xf32>
    %217 = vector.extract_strided_slice %213 {offsets = [0, 16], sizes = [1, 8], strides = [1, 1]} : vector<1x64xf32> to vector<1x8xf32>
    %218 = arith.addf %216, %217 : vector<1x8xf32>
    %219 = vector.extract_strided_slice %213 {offsets = [0, 24], sizes = [1, 8], strides = [1, 1]} : vector<1x64xf32> to vector<1x8xf32>
    %220 = arith.addf %218, %219 : vector<1x8xf32>
    %221 = vector.extract_strided_slice %213 {offsets = [0, 32], sizes = [1, 8], strides = [1, 1]} : vector<1x64xf32> to vector<1x8xf32>
    %222 = arith.addf %220, %221 : vector<1x8xf32>
    %223 = vector.extract_strided_slice %213 {offsets = [0, 40], sizes = [1, 8], strides = [1, 1]} : vector<1x64xf32> to vector<1x8xf32>
    %224 = arith.addf %222, %223 : vector<1x8xf32>
    %225 = vector.extract_strided_slice %213 {offsets = [0, 48], sizes = [1, 8], strides = [1, 1]} : vector<1x64xf32> to vector<1x8xf32>
    %226 = arith.addf %224, %225 : vector<1x8xf32>
    %227 = vector.extract_strided_slice %213 {offsets = [0, 56], sizes = [1, 8], strides = [1, 1]} : vector<1x64xf32> to vector<1x8xf32>
    %228 = arith.addf %226, %227 : vector<1x8xf32>
    %cst_33 = arith.constant 7.812500e-03 : f32
    %229 = vector.broadcast %cst_33 : f32 to vector<1x8xf32>
    %230 = arith.mulf %228, %229 : vector<1x8xf32>
    %231 = arith.mulf %209, %209 : vector<16x64xf32>
    %cst_34 = arith.constant dense<0.000000e+00> : vector<64xf32>
    %232 = vector.multi_reduction <add>, %231, %cst_34 [0] : vector<16x64xf32> to vector<64xf32>
    %233 = vector.shape_cast %232 : vector<64xf32> to vector<1x64xf32>
    %234 = vector.extract_strided_slice %233 {offsets = [0, 0], sizes = [1, 8], strides = [1, 1]} : vector<1x64xf32> to vector<1x8xf32>
    %235 = vector.extract_strided_slice %233 {offsets = [0, 8], sizes = [1, 8], strides = [1, 1]} : vector<1x64xf32> to vector<1x8xf32>
    %236 = arith.addf %234, %235 : vector<1x8xf32>
    %237 = vector.extract_strided_slice %233 {offsets = [0, 16], sizes = [1, 8], strides = [1, 1]} : vector<1x64xf32> to vector<1x8xf32>
    %238 = arith.addf %236, %237 : vector<1x8xf32>
    %239 = vector.extract_strided_slice %233 {offsets = [0, 24], sizes = [1, 8], strides = [1, 1]} : vector<1x64xf32> to vector<1x8xf32>
    %240 = arith.addf %238, %239 : vector<1x8xf32>
    %241 = vector.extract_strided_slice %233 {offsets = [0, 32], sizes = [1, 8], strides = [1, 1]} : vector<1x64xf32> to vector<1x8xf32>
    %242 = arith.addf %240, %241 : vector<1x8xf32>
    %243 = vector.extract_strided_slice %233 {offsets = [0, 40], sizes = [1, 8], strides = [1, 1]} : vector<1x64xf32> to vector<1x8xf32>
    %244 = arith.addf %242, %243 : vector<1x8xf32>
    %245 = vector.extract_strided_slice %233 {offsets = [0, 48], sizes = [1, 8], strides = [1, 1]} : vector<1x64xf32> to vector<1x8xf32>
    %246 = arith.addf %244, %245 : vector<1x8xf32>
    %247 = vector.extract_strided_slice %233 {offsets = [0, 56], sizes = [1, 8], strides = [1, 1]} : vector<1x64xf32> to vector<1x8xf32>
    %248 = arith.addf %246, %247 : vector<1x8xf32>
    %cst_35 = arith.constant 7.812500e-03 : f32
    %249 = vector.broadcast %cst_35 : f32 to vector<1x8xf32>
    %250 = arith.mulf %248, %249 : vector<1x8xf32>
    %251 = arith.mulf %230, %230 : vector<1x8xf32>
    %252 = arith.subf %250, %251 : vector<1x8xf32>
    %cst_36 = arith.constant 9.99999974E-6 : f32
    %253 = vector.broadcast %cst_36 : f32 to vector<1x8xf32>
    %254 = arith.addf %252, %253 : vector<1x8xf32>
    %255 = math.rsqrt %254 : vector<1x8xf32>
    %256 = arith.mulf %210, %255 : vector<1x8xf32>
    %257 = arith.mulf %230, %256 : vector<1x8xf32>
    %258 = arith.subf %211, %257 : vector<1x8xf32>
    %259 = tpu.concatenate %256, %256, %256, %256, %256, %256, %256, %256 in 1 : vector<1x8xf32>, vector<1x8xf32>, vector<1x8xf32>, vector<1x8xf32>, vector<1x8xf32>, vector<1x8xf32>, vector<1x8xf32>, vector<1x8xf32> -> vector<1x64xf32>
    %260 = vector.broadcast %259 : vector<1x64xf32> to vector<16x64xf32>
    %261 = arith.mulf %209, %260 : vector<16x64xf32>
    %262 = tpu.concatenate %258, %258, %258, %258, %258, %258, %258, %258 in 1 : vector<1x8xf32>, vector<1x8xf32>, vector<1x8xf32>, vector<1x8xf32>, vector<1x8xf32>, vector<1x8xf32>, vector<1x8xf32>, vector<1x8xf32> -> vector<1x64xf32>
    %263 = vector.broadcast %262 : vector<1x64xf32> to vector<16x64xf32>
    %264 = arith.addf %261, %263 : vector<16x64xf32>
    %cst_37 = arith.constant 0.000000e+00 : f32
    %265 = vector.broadcast %cst_37 : f32 to vector<16x64xf32>
    %266 = arith.maximumf %264, %265 : vector<16x64xf32>
    %267 = vector.extract_strided_slice %266 {offsets = [0, 0], sizes = [15, 64], strides = [1, 1]} : vector<16x64xf32> to vector<15x64xf32>
    %268 = vector.extract_strided_slice %266 {offsets = [1, 0], sizes = [15, 64], strides = [1, 1]} : vector<16x64xf32> to vector<15x64xf32>
    %269 = arith.maximumf %267, %268 : vector<15x64xf32>
    %270 = vector.extract_strided_slice %269 {offsets = [0, 0], sizes = [1, 64], strides = [1, 1]} : vector<15x64xf32> to vector<1x64xf32>
    %271 = vector.extract_strided_slice %269 {offsets = [2, 0], sizes = [1, 64], strides = [1, 1]} : vector<15x64xf32> to vector<1x64xf32>
    %272 = vector.extract_strided_slice %269 {offsets = [4, 0], sizes = [1, 64], strides = [1, 1]} : vector<15x64xf32> to vector<1x64xf32>
    %273 = vector.extract_strided_slice %269 {offsets = [6, 0], sizes = [1, 64], strides = [1, 1]} : vector<15x64xf32> to vector<1x64xf32>
    %274 = vector.extract_strided_slice %269 {offsets = [8, 0], sizes = [1, 64], strides = [1, 1]} : vector<15x64xf32> to vector<1x64xf32>
    %275 = vector.extract_strided_slice %269 {offsets = [10, 0], sizes = [1, 64], strides = [1, 1]} : vector<15x64xf32> to vector<1x64xf32>
    %276 = vector.extract_strided_slice %269 {offsets = [12, 0], sizes = [1, 64], strides = [1, 1]} : vector<15x64xf32> to vector<1x64xf32>
    %277 = vector.extract_strided_slice %269 {offsets = [14, 0], sizes = [1, 64], strides = [1, 1]} : vector<15x64xf32> to vector<1x64xf32>
    %278 = tpu.concatenate %270, %271, %272, %273, %274, %275, %276, %277 in 0 : vector<1x64xf32>, vector<1x64xf32>, vector<1x64xf32>, vector<1x64xf32>, vector<1x64xf32>, vector<1x64xf32>, vector<1x64xf32>, vector<1x64xf32> -> vector<8x64xf32>
    %279 = vector.extract_strided_slice %278 {offsets = [0, 0], sizes = [8, 56], strides = [1, 1]} : vector<8x64xf32> to vector<8x56xf32>
    %280 = vector.extract_strided_slice %278 {offsets = [0, 8], sizes = [8, 56], strides = [1, 1]} : vector<8x64xf32> to vector<8x56xf32>
    %281 = arith.maximumf %279, %280 : vector<8x56xf32>
    %282 = vector.extract_strided_slice %281 {offsets = [0, 0], sizes = [8, 8], strides = [1, 1]} : vector<8x56xf32> to vector<8x8xf32>
    %283 = vector.extract_strided_slice %281 {offsets = [0, 16], sizes = [8, 8], strides = [1, 1]} : vector<8x56xf32> to vector<8x8xf32>
    %284 = vector.extract_strided_slice %281 {offsets = [0, 32], sizes = [8, 8], strides = [1, 1]} : vector<8x56xf32> to vector<8x8xf32>
    %285 = vector.extract_strided_slice %281 {offsets = [0, 48], sizes = [8, 8], strides = [1, 1]} : vector<8x56xf32> to vector<8x8xf32>
    %286 = tpu.concatenate %282, %283, %284, %285 in 1 : vector<8x8xf32>, vector<8x8xf32>, vector<8x8xf32>, vector<8x8xf32> -> vector<8x32xf32>
    %287 = vector.extract_strided_slice %286 {offsets = [0, 0], sizes = [1, 32], strides = [1, 1]} : vector<8x32xf32> to vector<1x32xf32>
    %288 = vector.extract_strided_slice %286 {offsets = [1, 0], sizes = [1, 32], strides = [1, 1]} : vector<8x32xf32> to vector<1x32xf32>
    %289 = vector.extract_strided_slice %286 {offsets = [2, 0], sizes = [1, 32], strides = [1, 1]} : vector<8x32xf32> to vector<1x32xf32>
    %290 = vector.extract_strided_slice %286 {offsets = [3, 0], sizes = [1, 32], strides = [1, 1]} : vector<8x32xf32> to vector<1x32xf32>
    %291 = tpu.concatenate %287, %288, %289, %290 in 1 : vector<1x32xf32>, vector<1x32xf32>, vector<1x32xf32>, vector<1x32xf32> -> vector<1x128xf32>
    %292 = vector.extract_strided_slice %286 {offsets = [4, 0], sizes = [1, 32], strides = [1, 1]} : vector<8x32xf32> to vector<1x32xf32>
    %293 = vector.extract_strided_slice %286 {offsets = [5, 0], sizes = [1, 32], strides = [1, 1]} : vector<8x32xf32> to vector<1x32xf32>
    %294 = vector.extract_strided_slice %286 {offsets = [6, 0], sizes = [1, 32], strides = [1, 1]} : vector<8x32xf32> to vector<1x32xf32>
    %295 = vector.extract_strided_slice %286 {offsets = [7, 0], sizes = [1, 32], strides = [1, 1]} : vector<8x32xf32> to vector<1x32xf32>
    %296 = tpu.concatenate %292, %293, %294, %295 in 1 : vector<1x32xf32>, vector<1x32xf32>, vector<1x32xf32>, vector<1x32xf32> -> vector<1x128xf32>
    %297 = tpu.concatenate %291, %296 in 0 : vector<1x128xf32>, vector<1x128xf32> -> vector<2x128xf32>
    %c0_38 = arith.constant 0 : index
    %c0_39 = arith.constant 0 : index
    %298 = vector.load %arg13[%c0_38, %c0_39] : memref<128x10xf32, #tpu.memory_space<vmem>>, vector<128x10xf32>
    %cst_40 = arith.constant dense<0.000000e+00> : vector<2x10xf32>
    %299 = tpu.matmul %297, %298, %cst_40 {dimension_numbers = #tpu.dot_dimension_numbers<[1], [0], [0], [1], [0, 0, 1, 1], [], []>} : vector<2x128xf32>, vector<128x10xf32>, vector<2x10xf32> -> vector<2x10xf32>
    %c0_41 = arith.constant 0 : index
    %c0_42 = arith.constant 0 : index
    %300 = vector.load %arg14[%c0_41, %c0_42] : memref<1x10xf32, #tpu.memory_space<vmem>>, vector<1x10xf32>
    %301 = vector.broadcast %300 : vector<1x10xf32> to vector<2x10xf32>
    %302 = arith.addf %299, %301 : vector<2x10xf32>
    %c0_43 = arith.constant 0 : index
    %c0_44 = arith.constant 0 : index
    %303 = vector.load %arg15[%c0_43, %c0_44] : memref<2x10xf32, #tpu.memory_space<vmem>>, vector<2x10xf32>
    tpu.vector_store %arg15[%c0_43, %c0_44], %302 {strides = array<i32>} : memref<2x10xf32, #tpu.memory_space<vmem>>, vector<2x10xf32>,
    return
  }
}

</mosaic_0001>

<bundles_post_ra>
// kernel: fused_forward.1
= control target key start
LH: loop header
LB: loop body
LE: loop exit
PB: predicated region body
PF: predicated region fallthrough
CT: control target
= control target key end

     0   :  { %s1642_s11 = smov 4   ;;  %s2702_s0 = inlined_call_operand.vmem [shape: f32[32,64], index: 0, kind: input, shape index: {}]   ;;  %s2703_s1 = inlined_call_operand.vmem [shape: f32[576,128], index: 1, kind: input, shape index: {}]   ;;  %s2704_s2 = inlined_call_operand.vmem [shape: f32[1,128], index: 2, kind: input, shape index: {}]   ;;  %s2705_s3 = inlined_call_operand.vmem [shape: f32[1,8], index: 3, kind: input, shape index: {}]   ;;  %s2706_s4 = inlined_call_operand.vmem [shape: f32[1,8], index: 4, kind: input, shape index: {}]   ;;  %s2707_s5 = inlined_call_operand.vmem [shape: f32[1,8], index: 5, kind: input, shape index: {}]   ;;  %s2708_s6 = inlined_call_operand.vmem [shape: f32[1,8], index: 6, kind: input, shape index: {}]   ;;  %s2709_s7 = inlined_call_operand.vmem [shape: f32[576,64], index: 7, kind: input, shape index: {}]   ;;  %s2710_s8 = inlined_call_operand.vmem [shape: f32[1,64], index: 8, kind: input, shape index: {}]   ;;  %s2711_s9 = inlined_call_operand.vmem [shape: f32[1,8], index: 9, kind: input, shape index: {}]   ;;  %s2712_s10 = inlined_call_operand.vmem [shape: f32[1,8], index: 10, kind: input, shape index: {}]   ;;  %s2713_s11 = inlined_call_operand.vmem [shape: f32[1,8], index: 11, kind: input, shape index: {}]   ;;  %s2714_s12 = inlined_call_operand.vmem [shape: f32[1,8], index: 12, kind: input, shape index: {}]   ;;  %s2715_s13 = inlined_call_operand.vmem [shape: f32[128,10], index: 13, kind: input, shape index: {}]   ;;  %s2716_s14 = inlined_call_operand.vmem [shape: f32[1,10], index: 14, kind: input, shape index: {}]   ;;  %s2717_s15 = inlined_call_operand.hbm [shape: f32[2,10], index: 15, kind: output, shape index: {}]  }
   0x1   :  { %v53_v0 = vld [vmem:[%s2702_s0 + $0x10] sm:$0xff]  ;;  %v51_v1 = vld [vmem:[%s2702_s0] sm:$0xff] }
   0x2   :  { %82 = vrot.lane.b32.xlu1 %v53_v0, %s1642_s11  ;;  %57 = vrot.lane.b32.xlu0 %v51_v1, %s1642_s11 }
   0x3   :  { %20 = vsyncpa [#allocation3], 0  ;;  %v54_v2 = vld [vmem:[%s2702_s0 + $0x18] sm:$0xff]  ;;  %v52_v3 = vld [vmem:[%s2702_s0 + $0x8] sm:$0xff]  ;;  %vm63_vm0 = vcmask 31744   ;;  %vm66_vm1 = vcmask 556032  }
   0x4   :  { %vm71_vm2 = vcmask 1040384   ;;  %vm103_vm3 = vcmask 1041408   ;;  %vm121_vm4 = vcmask 1046528   ;;  %s1643_s0 = smov 60   ;;  %vm112_vm5 = vcmask 1045504   ;;  %s1644_s23 = smov 56  }
   0x5   :  { %s1645_s24 = smov 124   ;;  %s2725_s25 = smov 64   ;;  %vm127_vm6 = vcmask 1044480   ;;  %v259_v55 = vld [vmem:[%s2703_s1 + $0x78] sm:$0xff]  ;;  %v258_v56 = vld [vmem:[%s2703_s1 + $0x70] sm:$0xff]  ;;  %v257_v58 = vld [vmem:[%s2703_s1 + $0x68] sm:$0xff] }
   0x6   :  { %s1647_s5 = smov 120   ;;  %328 = vmatpush.msra.mxu0 %v259_v55  ;;  %v307_v59 = vld [vmem:[%s2703_s1 + $0x1f8] sm:$0xff]  ;;  %v306_v60 = vld [vmem:[%s2703_s1 + $0x1f0] sm:$0xff]  ;;  %v256_v61 = vld [vmem:[%s2703_s1 + $0x60] sm:$0xff]  ;;  %vm139_vm7 = vcmask 1043456   ;;  %vm2726_vm8 = vcmask 523264  }
   0x7   :  { %415 = vmatpush.msra.mxu3 %v307_v59  ;;  %v305_v62 = vld [vmem:[%s2703_s1 + $0x1e8] sm:$0xff]  ;;  %v255_v1 = vld [vmem:[%s2703_s1 + $0x58] sm:$0xff]  ;;  %s1650_s12 = smov 72   ;;  %s1651_s20 = smov 88   ;;  %vm2718_vm12 = vcmask 64512   ;;  %vm2719_vm13 = vcmask 130048  }
   0x8   :  { %329 = vmatpush.msra.mxu0 %v258_v56  ;;  %v281_v55 = vld [vmem:[%s2703_s1 + $0x128] sm:$0xff]  ;;  %v267_v59 = vld [vmem:[%s2703_s1 + $0xb8] sm:$0xff]  ;;  %s1652_s21 = smov 104   ;;  %s1653_s22 = smov 48   ;;  %vm2721_vm14 = vcmask 195584   ;;  %vm2720_vm15 = vcmask 261120  }
   0x9   :  { %416 = vmatpush.msra.mxu3 %v306_v60  ;;  %v313_v56 = vld [vmem:[%s2703_s1 + $0x228] sm:$0xff]  ;;  %v279_v60 = vld [vmem:[%s2703_s1 + $0x118] sm:$0xff]  ;;  %s1654_s26 = smov 80   ;;  %s1656_s6 = smov 40  }
   0xa   :  { %84 = vrot.lane.b32.xlu1 %v54_v2, %s1642_s11  ;;  %59 = vrot.lane.b32.xlu0 %v52_v3, %s1642_s11  ;;  %v304_v2 = vld [vmem:[%s2703_s1 + $0x1e0] sm:$0xff]  ;;  %s1649_s11 = smov 112   ;;  %s1657_s27 = smov 16  }
   0xb   :  { %330 = vmatpush.msra.mxu0 %v257_v58  ;;  %417 = vmatpush.msra.mxu3 %v305_v62  ;;  %v280_v58 = vld [vmem:[%s2703_s1 + $0x120] sm:$0xff]  ;;  %v266_v62 = vld [vmem:[%s2703_s1 + $0xb0] sm:$0xff]  ;;  %s1659_s28 = smov 8  }
   0xd   :  { %331 = vmatpush.msra.mxu0 %v256_v61  ;;  %418 = vmatpush.msra.mxu3 %v304_v2  ;;  %v312_v61 = vld [vmem:[%s2703_s1 + $0x220] sm:$0xff]  ;;  %v311_v2 = vld [vmem:[%s2703_s1 + $0x218] sm:$0xff] }
   0xf   :  { %332 = vmatpush.msra.mxu0 %v255_v1  ;;  %v277_v1 = vld [vmem:[%s2703_s1 + $0x108] sm:$0xff] }
  0x74   :  { %v83_v4 = vpop.permute.xlu1 %82  ;;  %v58_v5 = vpop.permute.xlu0 %57 }
  0x75   :  { %v88_v6 = vsel %vm63_vm0, 0.0, %v83_v4  ;;  %v64_v8 = vsel %vm63_vm0, 0.0, %v58_v5  ;;  %v254_v4 = vld [vmem:[%s2703_s1 + $0x50] sm:$0xff] }
  0x76   :  { %v90_v7 = vsel %vm66_vm1, %v88_v6, 0.0  ;;  %v67_v10 = vsel %vm66_vm1, %v64_v8, 0.0  ;;  %v303_v8 = vld [vmem:[%s2703_s1 + $0x1d8] sm:$0xff]  ;;  %333 = vmatpush.msra.mxu0 %v254_v4  ;;  %v276_v4 = vld [vmem:[%s2703_s1 + $0x100] sm:$0xff] }
  0x77   :  { %v94_v9 = vrot.slane %v90_v7, 7  ;;  %v72_v12 = vrot.slane %v67_v10, 7  ;;  %v253_v7 = vld [vmem:[%s2703_s1 + $0x48] sm:$0xff]  ;;  %419 = vmatpush.msra.mxu3 %v303_v8 }
  0x78   :  { %334 = vmatpush.msra.mxu0 %v253_v7  ;;  %v310_v7 = vld [vmem:[%s2703_s1 + $0x210] sm:$0xff] }
  0x79   :  { %v99_v11 = vsel %vm71_vm2, 0.0, %v94_v9  ;;  %v1755_v22 = vsel %vm71_vm2, 0.0, %v72_v12 }
  0x7a   :  { %v104_v17 = vrot.slane %v99_v11, 6  ;;  %v122_v32 = vrot.slane %v1755_v22, 1  ;;  %v133_v46 = vrot.slane %v1755_v22, 2  ;;  %v302_v11 = vld [vmem:[%s2703_s1 + $0x1d0] sm:$0xff] }
  0x7b   :  { %420 = vmatpush.msra.mxu3 %v302_v11  ;;  %v309_v11 = vld [vmem:[%s2703_s1 + $0x208] sm:$0xff] }
  0x7c   :  { %v85_v13 = vpop.permute.xlu1 %84  ;;  %v60_v14 = vpop.permute.xlu0 %59 }
  0x7d   :  { %v89_v15 = vsel %vm63_vm0, 0.0, %v85_v13  ;;  %v65_v16 = vsel %vm63_vm0, 0.0, %v60_v14  ;;  %v250_v13 = vld [vmem:[%s2703_s1 + $0x30] sm:$0xff]  ;;  %v249_v14 = vld [vmem:[%s2703_s1 + $0x28] sm:$0xff]  ;;  %vm2722_vm0 = vcmask 326656  }
  0x7e   :  { %v91_v18 = vsel %vm66_vm1, %v89_v15, 0.0  ;;  %v68_v19 = vsel %vm66_vm1, %v65_v16, 0.0  ;;  %v248_v15 = vld [vmem:[%s2703_s1 + $0x20] sm:$0xff]  ;;  %v247_v16 = vld [vmem:[%s2703_s1 + $0x18] sm:$0xff]  ;;  %vm694_vm1 = vcmask 392192  }
  0x7f   :  { %v95_v20 = vrot.slane %v91_v18, 7  ;;  %v73_v21 = vrot.slane %v68_v19, 7  ;;  %v245_v18 = vld [vmem:[%s2703_s1 + $0x8] sm:$0xff]  ;;  %v291_v19 = vld [vmem:[%s2703_s1 + $0x178] sm:$0xff] }
  0x80   :  { %386 = vmatpush.msra.mxu2 %v291_v19 }
  0x81   :  { %v96_v23 = vsel %vm71_vm2, %v94_v9, %v95_v20  ;;  %v100_v24 = vsel %vm71_vm2, %v95_v20, 0.0  ;;  %v1760_v25 = vsel %vm71_vm2, %v72_v12, %v73_v21  ;;  %v79_v26 = vsel %vm71_vm2, %v73_v21, 0.0  ;;  %v252_v9 = vld [vmem:[%s2703_s1 + $0x40] sm:$0xff]  ;;  %v251_v12 = vld [vmem:[%s2703_s1 + $0x38] sm:$0xff]  ;;  %v301_v20 = vld [vmem:[%s2703_s1 + $0x1c8] sm:$0xff] }
  0x82   :  { %v105_v27 = vrot.slane %v96_v23, 6  ;;  %v107_v28 = vrot.slane %v100_v24, 6  ;;  %v1764_v29 = vsel %vm103_vm3, %v79_v26, %v104_v17  ;;  %v1549_v30 = vpack.i.bf16 %v1760_v25, %v1755_v22  ;;  %335 = vmatpush.msra.mxu0 %v252_v9  ;;  %v244_v21 = vld [vmem:[%s2703_s1] sm:$0xff]  ;;  %v290_v23 = vld [vmem:[%s2703_s1 + $0x170] sm:$0xff]  ;;  %421 = vmatpush.msra.mxu3 %v301_v20  ;;  %v289_v26 = vld [vmem:[%s2703_s1 + $0x168] sm:$0xff] }
  0x83   :  { %v125_v31 = vrot.slane %v1764_v29, 1  ;;  %v123_v35 = vrot.slane %v1760_v25, 1  ;;  %v113_v36 = vrot.slane %v1764_v29, 2  ;;  %v134_v45 = vrot.slane %v1760_v25, 2  ;;  %v300_v24 = vld [vmem:[%s2703_s1 + $0x1c0] sm:$0xff]  ;;  %387 = vmatpush.msra.mxu2 %v290_v23 }
  0x84   :  { %v1771_v33 = vsel %vm103_vm3, %v104_v17, %v105_v27  ;;  %v1774_v34 = vsel %vm103_vm3, %v105_v27, %v107_v28  ;;  %1550 = vrot.lane.b32.xlu2 %v1549_v30, %s1643_s0  ;;  %v128_v51 = vrot.slane %v1764_v29, 3  ;;  %v140_v3 = vrot.slane %v1764_v29, 4  ;;  %336 = vmatpush.msra.mxu0 %v251_v12  ;;  %v246_v17 = vld [vmem:[%s2703_s1 + $0x10] sm:$0xff]  ;;  %v299_v27 = vld [vmem:[%s2703_s1 + $0x1b8] sm:$0xff]  ;;  %v288_v28 = vld [vmem:[%s2703_s1 + $0x160] sm:$0xff] }
  0x85   :  { %v114_v37 = vrot.slane %v1771_v33, 2  ;;  %v116_v38 = vrot.slane %v1774_v34, 2  ;;  %v124_v39 = vsel %vm121_vm4, %v122_v32, %v123_v35  ;;  %v126_v40 = vsel %vm121_vm4, %v123_v35, %v125_v31  ;;  %422 = vmatpush.msra.mxu3 %v300_v24  ;;  %388 = vmatpush.msra.mxu2 %v289_v26  ;;  %v298_v29 = vld [vmem:[%s2703_s1 + $0x1b0] sm:$0xff]  ;;  %v287_v31 = vld [vmem:[%s2703_s1 + $0x158] sm:$0xff]  ;;  %v297_v32 = vld [vmem:[%s2703_s1 + $0x1a8] sm:$0xff] }
  0x86   :  { %v1569_v41 = vpack.i.bf16 %v126_v40, %v124_v39  ;;  %v1797_v47 = vsel %vm112_vm5, %v133_v46, %v134_v45  ;;  %v1800_v48 = vsel %vm112_vm5, %v134_v45, %v113_v36  ;;  %v129_v49 = vrot.slane %v1771_v33, 3  ;;  %337 = vmatpush.msra.mxu0 %v250_v13  ;;  %v296_v35 = vld [vmem:[%s2703_s1 + $0x1a0] sm:$0xff]  ;;  %v315_v39 = vld [vmem:[%s2703_s1 + $0x238] sm:$0xff]  ;;  %v262_v12 = vld [vmem:[%s2703_s1 + $0x90] sm:$0xff] }
  0x87   :  { %v1784_v42 = vsel %vm112_vm5, %v113_v36, %v114_v37  ;;  %v1787_v43 = vsel %vm112_vm5, %v114_v37, %v116_v38  ;;  %v131_v50 = vrot.slane %v1774_v34, 3  ;;  %v1574_v52 = vpack.i.bf16 %v1800_v48, %v1797_v47  ;;  %423 = vmatpush.msra.mxu3 %v299_v27  ;;  %389 = vmatpush.msra.mxu2 %v288_v28  ;;  %v273_v36 = vld [vmem:[%s2703_s1 + $0xe8] sm:$0xff]  ;;  %v295_v38 = vld [vmem:[%s2703_s1 + $0x198] sm:$0xff]  ;;  %v272_v40 = vld [vmem:[%s2703_s1 + $0xe0] sm:$0xff] }
  0x88   :  { %1570 = vrot.lane.b32.xlu1 %v1569_v41, %s1644_s23  ;;  %1560 = vrot.lane.b32.xlu0 %v1569_v41, %s1645_s24  ;;  %v1554_v44 = vpack.i.bf16 %v1787_v43, %v1784_v42  ;;  %v130_v53 = vsel %vm127_vm6, %v128_v51, %v129_v49  ;;  %v141_v63 = vrot.slane %v1771_v33, 4  ;;  %v143_v0 = vrot.slane %v1774_v34, 4  ;;  %v274_v33 = vld [vmem:[%s2703_s1 + $0xf0] sm:$0xff]  ;;  %v285_v37 = vld [vmem:[%s2703_s1 + $0x148] sm:$0xff] }
  0x89   :  { %v132_v54 = vsel %vm127_vm6, %v129_v49, %v131_v50  ;;  %338 = vmatpush.msra.mxu0 %v249_v14  ;;  %424 = vmatpush.msra.mxu3 %v298_v29  ;;  %v286_v34 = vld [vmem:[%s2703_s1 + $0x150] sm:$0xff]  ;;  %v271_v45 = vld [vmem:[%s2703_s1 + $0xd8] sm:$0xff]  ;;  %v293_v49 = vld [vmem:[%s2703_s1 + $0x188] sm:$0xff] }
  0x8a   :  { %v1589_v57 = vpack.i.bf16 %v132_v54, %v130_v53  ;;  %v1850_v5 = vsel %vm139_vm7, %v140_v3, %v141_v63  ;;  %v1853_v6 = vsel %vm139_vm7, %v141_v63, %v143_v0  ;;  %390 = vmatpush.msra.mxu2 %v287_v31  ;;  %v283_v46 = vld [vmem:[%s2703_s1 + $0x138] sm:$0xff]  ;;  %v314_v50 = vld [vmem:[%s2703_s1 + $0x230] sm:$0xff]  ;;  %v265_v0 = vld [vmem:[%s2703_s1 + $0xa8] sm:$0xff] }
  0x8b   :  { %v1594_v10 = vpack.i.bf16 %v1853_v6, %v1850_v5  ;;  %339 = vmatpush.msra.mxu0 %v248_v15  ;;  %425 = vmatpush.msra.mxu3 %v297_v32  ;;  %v270_v51 = vld [vmem:[%s2703_s1 + $0xd0] sm:$0xff]  ;;  %v264_v3 = vld [vmem:[%s2703_s1 + $0xa0] sm:$0xff]  ;;  %v261_v15 = vld [vmem:[%s2703_s1 + $0x88] sm:$0xff] }
  0x8c   :  { %1555 = vrot.lane.b32.xlu2 %v1554_v44, %s1643_s0  ;;  %391 = vmatpush.msra.mxu2 %v286_v34  ;;  %v294_v44 = vld [vmem:[%s2703_s1 + $0x190] sm:$0xff]  ;;  %v308_v14 = vld [vmem:[%s2703_s1 + $0x200] sm:$0xff] }
  0x8d   :  { %340 = vmatpush.msra.mxu0 %v247_v16  ;;  %426 = vmatpush.msra.mxu3 %v296_v35  ;;  %v278_v63 = vld [vmem:[%s2703_s1 + $0x110] sm:$0xff]  ;;  %v260_v16 = vld [vmem:[%s2703_s1 + $0x80] sm:$0xff] }
  0x8e   :  { %392 = vmatpush.msra.mxu2 %v285_v37 }
  0x8f   :  { %341 = vmatpush.msra.mxu0 %v246_v17  ;;  %427 = vmatpush.msra.mxu3 %v295_v38 }
  0x90   :  { %1580 = vrot.lane.b32.xlu1 %v1569_v41, %s2725_s25  ;;  %1565 = vrot.lane.b32.xlu0 %v1549_v30, %s1647_s5  ;;  %v275_v30 = vld [vmem:[%s2703_s1 + $0xf8] sm:$0xff]  ;;  %v284_v41 = vld [vmem:[%s2703_s1 + $0x140] sm:$0xff] }
  0x91   :  { %342 = vmatpush.msra.mxu0 %v245_v18  ;;  %357 = vmatpush.msra.mxu1 %v275_v30 }
  0x92   :  { %393 = vmatpush.msra.mxu2 %v284_v41  ;;  %428 = vmatpush.msra.mxu3 %v294_v44 }
  0x93   :  { %343 = vmatpush.msra.mxu0 %v244_v21  ;;  %358 = vmatpush.msra.mxu1 %v274_v33 }
  0x94   :  { %1575 = vrot.lane.b32.xlu2 %v1574_v52, %s1643_s0  ;;  %394 = vmatpush.msra.mxu2 %v283_v46  ;;  %v282_v52 = vld [vmem:[%s2703_s1 + $0x130] sm:$0xff] }
  0x95   :  { %359 = vmatpush.msra.mxu1 %v273_v36  ;;  %452 = vmatpush.msrb.mxu0 %v315_v39 }
  0x96   :  { %429 = vmatpush.msra.mxu3 %v293_v49  ;;  %395 = vmatpush.msra.mxu2 %v282_v52 }
  0x97   :  { %360 = vmatpush.msra.mxu1 %v272_v40  ;;  %453 = vmatpush.msrb.mxu0 %v314_v50 }
  0x98   :  { %1590 = vrot.lane.b32.xlu1 %v1589_v57, %s1644_s23  ;;  %1585 = vrot.lane.b32.xlu0 %v1589_v57, %s1645_s24  ;;  %v268_v57 = vld [vmem:[%s2703_s1 + $0xc0] sm:$0xff]  ;;  %s1655_s24 = smov 24  }
  0x99   :  { %361 = vmatpush.msra.mxu1 %v271_v45  ;;  %454 = vmatpush.msrb.mxu0 %v313_v56 }
  0x9a   :  { %396 = vmatpush.msra.mxu2 %v281_v55 }
  0x9b   :  { %362 = vmatpush.msra.mxu1 %v270_v51  ;;  %455 = vmatpush.msrb.mxu0 %v312_v61 }
  0x9c   :  { %219 = vrot.lane.b32.xlu2 %v1797_v47, %s1647_s5  ;;  %397 = vmatpush.msra.mxu2 %v280_v58 }
  0x9d   :  { %456 = vmatpush.msrb.mxu0 %v311_v2 }
  0x9e   :  { %398 = vmatpush.msra.mxu2 %v279_v60 }
  0x9f   :  { %457 = vmatpush.msrb.mxu0 %v310_v7 }
  0xa0   :  { %163 = vrot.lane.b32.xlu1 %v1784_v42, %s1647_s5  ;;  %221 = vrot.lane.b32.xlu0 %v1800_v48, %s1647_s5 }
  0xa1   :  { %399 = vmatpush.msra.mxu2 %v278_v63  ;;  %458 = vmatpush.msrb.mxu0 %v309_v11 }
  0xa3   :  { %400 = vmatpush.msra.mxu2 %v277_v1  ;;  %459 = vmatpush.msrb.mxu0 %v308_v14 }
  0xa4   :  { %1595 = vrot.lane.b32.xlu2 %v1594_v10, %s1643_s0  ;;  %v263_v10 = vld [vmem:[%s2703_s1 + $0x98] sm:$0xff]  ;;  %s1658_s0 = smov 32  }
  0xa5   :  { %401 = vmatpush.msra.mxu2 %v276_v4 }
  0xa8   :  { %165 = vrot.lane.b32.xlu1 %v1787_v43, %s1647_s5  ;;  %223 = vrot.lane.b32.xlu0 %v1850_v5, %s1647_s5 }
  0xac   :  { %175 = vrot.lane.b32.xlu2 %v130_v53, %s2725_s25  ;;  %v292_v53 = vld [vmem:[%s2703_s1 + $0x180] sm:$0xff] }
  0xad   :  { %430 = vmatpush.msra.mxu3 %v292_v53 }
  0xb0   :  { %225 = vrot.lane.b32.xlu0 %v1853_v6, %s1647_s5 }
  0xb4   :  { %177 = vrot.lane.b32.xlu2 %v132_v54, %s2725_s25  ;;  %v269_v54 = vld [vmem:[%s2703_s1 + $0xc8] sm:$0xff] }
  0xb5   :  { %363 = vmatpush.msra.mxu1 %v269_v54 }
  0xb7   :  { %364 = vmatpush.msra.mxu1 %v268_v57 }
  0xb9   :  { %365 = vmatpush.msra.mxu1 %v267_v59 }
  0xbb   :  { %366 = vmatpush.msra.mxu1 %v266_v62 }
  0xbd   :  { %367 = vmatpush.msra.mxu1 %v265_v0 }
  0xbf   :  { %368 = vmatpush.msra.mxu1 %v264_v3 }
  0xc1   :  { %369 = vmatpush.msra.mxu1 %v263_v10 }
  0xc3   :  { %370 = vmatpush.msra.mxu1 %v262_v12 }
  0xc5   :  { %371 = vmatpush.msra.mxu1 %v261_v15  ;;  %v1609_v15 = vld [vmem:[%s2704_s2] ss:$0 sm:$0xff]  ;;  %s1648_s2 = smov 96  }
  0xc7   :  { %372 = vmatpush.msra.mxu1 %v260_v16 }
  0xde   :  { %v1551_v8 = vpop.permute.xlu2 %1550 }
  0xdf   :  { %v1552_v9 = vunpack.i.l.bf16 %v1551_v8  ;;  %v1553_v17 = vunpack.i.h.bf16 %v1551_v8 }
  0xe1   :  { %v228_v13 = vsel %vm2726_vm8, %v1755_v22, %v1552_v9  ;;  %v229_v18 = vsel %vm2726_vm8, %v1760_v25, %v1553_v17 }
  0xe2   :  { %344 = vmatmul.f32.vlgmr.msra.gmra.mxu0 %v228_v13 }
  0xe6   :  { %v1556_v22 = vpop.permute.xlu2 %1555 }
  0xe7   :  { %v1557_v19 = vunpack.i.l.bf16 %v1556_v22  ;;  %v1558_v26 = vunpack.i.h.bf16 %v1556_v22 }
  0xe9   :  { %v230_v23 = vsel %vm2726_vm8, %v1784_v42, %v1557_v19  ;;  %v231_v29 = vsel %vm2726_vm8, %v1787_v43, %v1558_v26 }
  0xea   :  { %347 = vmatmul.f32.gmra.mxu0 %v229_v18 }
  0xee   :  { %v1576_v20 = vpop.permute.xlu2 %1575 }
  0xef   :  { %v1577_v21 = vunpack.i.l.bf16 %v1576_v20  ;;  %v1578_v27 = vunpack.i.h.bf16 %v1576_v20 }
  0xf1   :  { %v240_v24 = vsel %vm2726_vm8, %v1797_v47, %v1577_v21  ;;  %v241_v25 = vsel %vm2726_vm8, %v1800_v48, %v1578_v27 }
  0xf2   :  { %350 = vmatmul.f32.gmra.mxu0 %v230_v23  ;;  %431 = vmatmul.f32.vlgmr.msra.gmra.mxu3 %v240_v24 }
  0xf6   :  { %v220_v28 = vpop.permute.xlu2 %219 }
  0xfa   :  { %353 = vmatmul.f32.gmra.mxu0 %v231_v29  ;;  %434 = vmatmul.f32.gmra.mxu3 %v241_v25  ;;  %v1571_v30 = vpop.permute.xlu1 %1570  ;;  %v1561_v31 = vpop.permute.xlu0 %1560 }
  0xfb   :  { %v1572_v32 = vunpack.i.l.bf16 %v1571_v30  ;;  %v1562_v42 = vunpack.i.l.bf16 %v1561_v31  ;;  %v1573_v36 = vunpack.i.h.bf16 %v1571_v30  ;;  %v1563_v37 = vunpack.i.h.bf16 %v1561_v31 }
  0xfd   :  { %v236_v47 = vsel %vm2726_vm8, %v1562_v42, %v1572_v32  ;;  %v237_v44 = vsel %vm2726_vm8, %v1563_v37, %v1573_v36 }
  0xfe   :  { %v1596_v33 = vpop.permute.xlu2 %1595  ;;  %402 = vmatmul.f32.vlgmr.msra.gmra.mxu2 %v236_v47 }
  0xff   :  { %v1597_v34 = vunpack.i.l.bf16 %v1596_v33  ;;  %v1598_v40 = vunpack.i.h.bf16 %v1596_v33 }
 0x101   :  { %v242_v35 = vsel %vm2726_vm8, %v1850_v5, %v1597_v34  ;;  %v243_v45 = vsel %vm2726_vm8, %v1853_v6, %v1598_v40 }
 0x102   :  { %437 = vmatmul.f32.gmra.mxu3 %v242_v35  ;;  %1508 = vmatmul.msk.f32.vlgmr.msrb.gmra.mxu0 %vm2726_vm8, %v220_v28  ;;  %v1581_v43 = vpop.permute.xlu1 %1580  ;;  %v1566_v48 = vpop.permute.xlu0 %1565 }
 0x103   :  { %v1582_v38 = vunpack.i.l.bf16 %v1581_v43  ;;  %v1567_v39 = vunpack.i.l.bf16 %v1566_v48  ;;  %v1583_v5 = vunpack.i.h.bf16 %v1581_v43  ;;  %v1568_v46 = vunpack.i.h.bf16 %v1566_v48 }
 0x105   :  { %v232_v41 = vsel %vm2726_vm8, %v1567_v39, %v1582_v38  ;;  %v233_v53 = vsel %vm2726_vm8, %v1568_v46, %v1583_v5 }
 0x106   :  { %373 = vmatmul.f32.vlgmr.msra.gmra.mxu1 %v232_v41  ;;  %405 = vmatmul.f32.gmra.mxu2 %v237_v44  ;;  %v176_v55 = vpop.permute.xlu2 %175 }
 0x10a   :  { %440 = vmatmul.f32.gmra.mxu3 %v243_v45  ;;  %v1591_v49 = vpop.permute.xlu1 %1590  ;;  %v1586_v50 = vpop.permute.xlu0 %1585 }
 0x10b   :  { %v1592_v51 = vunpack.i.l.bf16 %v1591_v49  ;;  %v1587_v52 = vunpack.i.l.bf16 %v1586_v50  ;;  %v1593_v56 = vunpack.i.h.bf16 %v1591_v49  ;;  %v1588_v57 = vunpack.i.h.bf16 %v1586_v50 }
 0x10d   :  { %v238_v54 = vsel %vm2726_vm8, %v1587_v52, %v1592_v51  ;;  %v239_v60 = vsel %vm2726_vm8, %v1588_v57, %v1593_v56 }
 0x10e   :  { %376 = vmatmul.f32.gmra.mxu1 %v233_v53  ;;  %408 = vmatmul.f32.gmra.mxu2 %v238_v54  ;;  %v178_v63 = vpop.permute.xlu2 %177 }
 0x112   :  { %v164_v58 = vpop.permute.xlu1 %163  ;;  %v222_v59 = vpop.permute.xlu0 %221 }
 0x113   :  { %1509 = vmatmul.msk.f32.gmra.mxu0 %vm2726_vm8, %v222_v59  ;;  %v234_v6 = vsel %vm2726_vm8, %v164_v58, %v176_v55 }
 0x116   :  { %379 = vmatmul.f32.gmra.mxu1 %v234_v6  ;;  %411 = vmatmul.f32.gmra.mxu2 %v239_v60 }
 0x11a   :  { %v166_v61 = vpop.permute.xlu1 %165  ;;  %v224_v62 = vpop.permute.xlu0 %223 }
 0x11b   :  { %1510 = vmatmul.msk.f32.gmra.mxu0 %vm2726_vm8, %v224_v62  ;;  %v235_v0 = vsel %vm2726_vm8, %v166_v61, %v178_v63 }
 0x11e   :  { %382 = vmatmul.f32.gmra.mxu1 %v235_v0 }
 0x122   :  { %v226_v1 = vpop.permute.xlu0 %225 }
 0x123   :  { %1511 = vmatmul.msk.f32.gmra.mxu0 %vm2726_vm8, %v226_v1 }
 0x15f   :  { %v345_v2 = vpop.f32.mrf.mxu0 }
 0x160   :  { %v346_v17 = vadd.f32 %v1609_v15, %v345_v2 }
 0x167   :  { %v348_v3 = vpop.f32.mrf.mxu0 }
 0x168   :  { %v349_v16 = vadd.f32 %v1609_v15, %v348_v3 }
 0x16f   :  { %v351_v4 = vpop.f32.mrf.mxu0 }
 0x170   :  { %v352_v19 = vadd.f32 %v1609_v15, %v351_v4 }
 0x175   :  { %v432_v8 = vpop.f32.mrf.mxu3 }
 0x177   :  { %v354_v7 = vpop.f32.mrf.mxu0 }
 0x178   :  { %v355_v31 = vadd.f32 %v1609_v15, %v354_v7 }
 0x17d   :  { %v435_v13 = vpop.f32.mrf.mxu3 }
 0x17f   :  { %v461_v11 = vpop.f32.mrf.mxu0 }
 0x181   :  { %v403_v9 = vpop.f32.mrf.mxu2 }
 0x183   :  { %v374_v10 = vpop.f32.mrf.mxu1 }
 0x184   :  { %v375_v20 = vadd.f32 %v374_v10, %v346_v17 }
 0x185   :  { %v438_v27 = vpop.f32.mrf.mxu3 }
 0x186   :  { %v404_v28 = vadd.f32 %v403_v9, %v375_v20 }
 0x188   :  { %v433_v32 = vadd.f32 %v432_v8, %v404_v28 }
 0x189   :  { %v406_v12 = vpop.f32.mrf.mxu2 }
 0x18a   :  { %v2089_v36 = vadd.f32 %v461_v11, %v433_v32 }
 0x18b   :  { %v377_v14 = vpop.f32.mrf.mxu1 }
 0x18c   :  { %v378_v22 = vadd.f32 %v377_v14, %v349_v16  ;;  %v546_v54 = vmul.f32 %v2089_v36, %v2089_v36 }
 0x18d   :  { %v441_v48 = vpop.f32.mrf.mxu3 }
 0x18e   :  { %v407_v24 = vadd.f32 %v406_v12, %v378_v22 }
 0x190   :  { %v464_v18 = vpop.f32.mrf.mxu0  ;;  %v436_v25 = vadd.f32 %v435_v13, %v407_v24 }
 0x191   :  { %v409_v21 = vpop.f32.mrf.mxu2 }
 0x192   :  { %v2087_v47 = vadd.f32 %v464_v18, %v436_v25 }
 0x193   :  { %v380_v23 = vpop.f32.mrf.mxu1 }
 0x194   :  { %v381_v26 = vadd.f32 %v380_v23, %v352_v19  ;;  %v475_v38 = vadd.f32 %v2087_v47, %v2089_v36  ;;  %v547_v52 = vmul.f32 %v2087_v47, %v2087_v47 }
 0x196   :  { %v410_v29 = vadd.f32 %v409_v21, %v381_v26  ;;  %v550_v56 = vadd.f32 %v547_v52, %v546_v54 }
 0x198   :  { %v467_v30 = vpop.f32.mrf.mxu0  ;;  %v439_v42 = vadd.f32 %v438_v27, %v410_v29 }
 0x199   :  { %v412_v35 = vpop.f32.mrf.mxu2 }
 0x19a   :  { %v2091_v37 = vadd.f32 %v467_v30, %v439_v42 }
 0x19b   :  { %v383_v33 = vpop.f32.mrf.mxu1 }
 0x19c   :  { %v384_v34 = vadd.f32 %v383_v33, %v355_v31  ;;  %v476_v41 = vadd.f32 %v475_v38, %v2091_v37  ;;  %v548_v55 = vmul.f32 %v2091_v37, %v2091_v37 }
 0x19e   :  { %v413_v43 = vadd.f32 %v412_v35, %v384_v34  ;;  %v551_v58 = vadd.f32 %v550_v56, %v548_v55 }
 0x1a0   :  { %v442_v39 = vadd.f32 %v441_v48, %v413_v43  ;;  %v470_v40 = vpop.f32.mrf.mxu0 }
 0x1a2   :  { %v2096_v44 = vadd.f32 %v470_v40, %v442_v39 }
 0x1a4   :  { %v477_v45 = vadd.f32 %v476_v41, %v2096_v44  ;;  %v549_v57 = vmul.f32 %v2096_v44, %v2096_v44 }
 0x1a6   :  { %v478_v5 = vrot.slane %v477_v45, 4  ;;  %v552_v59 = vadd.f32 %v551_v58, %v549_v57 }
 0x1a8   :  { %v479_v46 = vadd.f32 %v478_v5, %v477_v45  ;;  %v553_v6 = vrot.slane %v552_v59, 4 }
 0x1aa   :  { %v480_v49 = vrot.slane %v479_v46, 2  ;;  %v554_v60 = vadd.f32 %v553_v6, %v552_v59 }
 0x1ac   :  { %v481_v50 = vadd.f32 %v480_v49, %v479_v46  ;;  %v555_v61 = vrot.slane %v554_v60, 2 }
 0x1ae   :  { %v482_v51 = vrot.slane %v481_v50, 1  ;;  %v556_v62 = vadd.f32 %v555_v61, %v554_v60 }
 0x1b0   :  { %v2101_v53 = vadd.f32 %v482_v51, %v481_v50  ;;  %v557_v63 = vrot.slane %v556_v62, 1 }
 0x1b2   :  { %497 = vrot.lane.b32.xlu0 %v2101_v53, %s1648_s2  ;;  %489 = vrot.lane.b32.xlu2 %v2101_v53, %s1649_s11  ;;  %v558_v0 = vadd.f32 %v557_v63, %v556_v62 }
 0x1b3   :  { %485 = vrot.lane.b32.xlu1 %v2101_v53, %s1647_s5 }
 0x1ba   :  { %509 = vrot.lane.b32.xlu0 %v2101_v53, %s1650_s12  ;;  %501 = vrot.lane.b32.xlu2 %v2101_v53, %s1651_s20 }
 0x1bb   :  { %493 = vrot.lane.b32.xlu1 %v2101_v53, %s1652_s21 }
 0x1c2   :  { %521 = vrot.lane.b32.xlu0 %v2101_v53, %s1653_s22  ;;  %513 = vrot.lane.b32.xlu2 %v2101_v53, %s2725_s25 }
 0x1c3   :  { %505 = vrot.lane.b32.xlu1 %v2101_v53, %s1654_s26 }
 0x1ca   :  { %533 = vrot.lane.b32.xlu0 %v2101_v53, %s1655_s24  ;;  %525 = vrot.lane.b32.xlu2 %v2101_v53, %s1656_s6 }
 0x1cb   :  { %517 = vrot.lane.b32.xlu1 %v2101_v53, %s1644_s23 }
 0x1d2   :  { %560 = vrot.lane.b32.xlu0 %v558_v0, %s1647_s5  ;;  %537 = vrot.lane.b32.xlu2 %v2101_v53, %s1657_s27 }
 0x1d3   :  { %529 = vrot.lane.b32.xlu1 %v2101_v53, %s1658_s0 }
 0x1da   :  { %572 = vrot.lane.b32.xlu0 %v558_v0, %s1648_s2  ;;  %564 = vrot.lane.b32.xlu2 %v558_v0, %s1649_s11 }
 0x1db   :  { %568 = vrot.lane.b32.xlu1 %v558_v0, %s1652_s21 }
 0x1e2   :  { %584 = vrot.lane.b32.xlu0 %v558_v0, %s1650_s12  ;;  %576 = vrot.lane.b32.xlu2 %v558_v0, %s1651_s20 }
 0x1e3   :  { %580 = vrot.lane.b32.xlu1 %v558_v0, %s1654_s26 }
 0x1ea   :  { %596 = vrot.lane.b32.xlu0 %v558_v0, %s1653_s22  ;;  %588 = vrot.lane.b32.xlu2 %v558_v0, %s2725_s25 }
 0x1eb   :  { %592 = vrot.lane.b32.xlu1 %v558_v0, %s1644_s23 }
 0x1f2   :  { %608 = vrot.lane.b32.xlu0 %v558_v0, %s1655_s24  ;;  %600 = vrot.lane.b32.xlu2 %v558_v0, %s1656_s6 }
 0x1f3   :  { %604 = vrot.lane.b32.xlu1 %v558_v0, %s1658_s0 }
 0x1fa   :  { %616 = vrot.lane.b32.xlu0 %v558_v0, %s1659_s28  ;;  %612 = vrot.lane.b32.xlu2 %v558_v0, %s1657_s27 }
 0x1fb   :  { %541 = vrot.lane.b32.xlu1 %v2101_v53, %s1659_s28 }
 0x20c   :  { %v490_v1 = vpop.permute.xlu2 %489 }
 0x214   :  { %v502_v2 = vpop.permute.xlu2 %501 }
 0x21c   :  { %v514_v4 = vpop.permute.xlu2 %513 }
 0x224   :  { %v498_v3 = vpop.permute.xlu0 %497  ;;  %v526_v10 = vpop.permute.xlu2 %525 }
 0x225   :  { %v486_v7 = vpop.permute.xlu1 %485 }
 0x226   :  { %v488_v16 = vadd.f32 %v486_v7, %v2101_v53 }
 0x228   :  { %v492_v22 = vadd.f32 %v490_v1, %v488_v16 }
 0x22c   :  { %v510_v8 = vpop.permute.xlu0 %509  ;;  %v538_v13 = vpop.permute.xlu2 %537 }
 0x22d   :  { %v494_v9 = vpop.permute.xlu1 %493 }
 0x22e   :  { %v496_v20 = vadd.f32 %v494_v9, %v492_v22 }
 0x230   :  { %v500_v23 = vadd.f32 %v498_v3, %v496_v20 }
 0x232   :  { %v504_v29 = vadd.f32 %v502_v2, %v500_v23 }
 0x234   :  { %v522_v11 = vpop.permute.xlu0 %521  ;;  %v565_v17 = vpop.permute.xlu2 %564 }
 0x235   :  { %v506_v12 = vpop.permute.xlu1 %505 }
 0x236   :  { %v508_v30 = vadd.f32 %v506_v12, %v504_v29 }
 0x238   :  { %v512_v32 = vadd.f32 %v510_v8, %v508_v30 }
 0x23a   :  { %v516_v48 = vadd.f32 %v514_v4, %v512_v32 }
 0x23c   :  { %v534_v14 = vpop.permute.xlu0 %533  ;;  %v577_v27 = vpop.permute.xlu2 %576 }
 0x23d   :  { %v518_v15 = vpop.permute.xlu1 %517 }
 0x23e   :  { %v520_v39 = vadd.f32 %v518_v15, %v516_v48 }
 0x240   :  { %v524_v5 = vadd.f32 %v522_v11, %v520_v39 }
 0x242   :  { %v528_v51 = vadd.f32 %v526_v10, %v524_v5 }
 0x244   :  { %v561_v18 = vpop.permute.xlu0 %560  ;;  %v589_v43 = vpop.permute.xlu2 %588 }
 0x245   :  { %v530_v19 = vpop.permute.xlu1 %529  ;;  %v563_v21 = vadd.f32 %v561_v18, %v558_v0  ;;  %v474_v18 = vld [vmem:[%s2706_s4] sm:$0x1] }
 0x246   :  { %v532_v52 = vadd.f32 %v530_v19, %v528_v51 }
 0x247   :  { %v567_v26 = vadd.f32 %v565_v17, %v563_v21 }
 0x248   :  { %v536_v57 = vadd.f32 %v534_v14, %v532_v52  ;;  %v473_v14 = vld [vmem:[%s2705_s3] sm:$0x1] }
 0x24a   :  { %v540_v61 = vadd.f32 %v538_v13, %v536_v57 }
 0x24c   :  { %v573_v24 = vpop.permute.xlu0 %572  ;;  %v601_v50 = vpop.permute.xlu2 %600 }
 0x24d   :  { %v569_v28 = vpop.permute.xlu1 %568 }
 0x24e   :  { %v571_v25 = vadd.f32 %v569_v28, %v567_v26 }
 0x250   :  { %v575_v31 = vadd.f32 %v573_v24, %v571_v25 }
 0x252   :  { %v579_v33 = vadd.f32 %v577_v27, %v575_v31 }
 0x254   :  { %v585_v42 = vpop.permute.xlu0 %584  ;;  %v613_v59 = vpop.permute.xlu2 %612 }
 0x255   :  { %v581_v34 = vpop.permute.xlu1 %580 }
 0x256   :  { %v583_v35 = vadd.f32 %v581_v34, %v579_v33 }
 0x258   :  { %v587_v38 = vadd.f32 %v585_v42, %v583_v35 }
 0x25a   :  { %v591_v41 = vadd.f32 %v589_v43, %v587_v38 }
 0x25c   :  { %v597_v40 = vpop.permute.xlu0 %596 }
 0x25d   :  { %v593_v45 = vpop.permute.xlu1 %592 }
 0x25e   :  { %v595_v46 = vadd.f32 %v593_v45, %v591_v41 }
 0x260   :  { %v599_v49 = vadd.f32 %v597_v40, %v595_v46 }
 0x262   :  { %v603_v54 = vadd.f32 %v601_v50, %v599_v49 }
 0x264   :  { %v609_v53 = vpop.permute.xlu0 %608 }
 0x265   :  { %v605_v55 = vpop.permute.xlu1 %604 }
 0x266   :  { %v607_v56 = vadd.f32 %v605_v55, %v603_v54 }
 0x268   :  { %v611_v58 = vadd.f32 %v609_v53, %v607_v56 }
 0x26a   :  { %v615_v60 = vadd.f32 %v613_v59, %v611_v58 }
 0x26c   :  { %v617_v6 = vpop.permute.xlu0 %616 }
 0x26d   :  { %v542_v62 = vpop.permute.xlu1 %541  ;;  %v619_v63 = vadd.f32 %v617_v6, %v615_v60 }
 0x26e   :  { %v544_v0 = vadd.f32 %v542_v62, %v540_v61 }
 0x26f   :  { %v620_v2 = vmul.f32 0.001953125, %v619_v63 }
 0x270   :  { %v545_v1 = vmul.f32 0.001953125, %v544_v0 }
 0x272   :  { %v621_v3 = vmul.f32 %v545_v1, %v545_v1 }
 0x274   :  { %v622_v4 = vsub.f32 %v620_v2, %v621_v3 }
 0x276   :  { %v623_v7 = vadd.f32 1e-05, %v622_v4 }
 0x278   :  { %1612 = vrsqrt.f32 %v623_v7  ;;  %vm630_vm10 = vweird.f32 %v623_v7 }
 0x27e   :  { %v1613_v8 = vpop.eup %1612 }
 0x27f   :  { %v625_v9 = vmul.f32 %v1613_v8, %v623_v7  ;;  %vm631_vm9 = vweird.f32 %v1613_v8 }
 0x280   :  { %vm632_vm11 = vmor %vm630_vm10, %vm631_vm9  ;;  %vm696_vm9 = vcmask 457728   ;;  %vm699_vm10 = vcmask 588800  }
 0x281   :  { %v626_v10 = vmul.f32 %v1613_v8, %v625_v9 }
 0x283   :  { %v627_v11 = vmul.f32 0.5, %v626_v10 }
 0x285   :  { %v628_v12 = vsub.f32 1.5, %v627_v11 }
 0x287   :  { %v629_v13 = vmul.f32 %v1613_v8, %v628_v12 }
 0x289   :  { %v633_v15 = vsel %vm632_vm11, %v1613_v8, %v629_v13  ;;  %vm701_vm11 = vcmask 654336  }
 0x28a   :  { %v634_v16 = vmul.f32 %v633_v15, %v473_v14 }
 0x28c   :  { %v638_v17 = vperm.slane %v634_v16, 0  ;;  %v635_v22 = vmul.f32 %v634_v16, %v545_v1 }
 0x28e   :  { %645 = vrot.lane.b32.xlu0 %v638_v17, %s1655_s24  ;;  %642 = vrot.lane.b32.xlu2 %v638_v17, %s1657_s27  ;;  %v636_v19 = vsub.f32 %v474_v18, %v635_v22 }
 0x28f   :  { %639 = vrot.lane.b32.xlu1 %v638_v17, %s1659_s28 }
 0x290   :  { %v719_v20 = vperm.slane %v636_v19, 0 }
 0x296   :  { %654 = vrot.lane.b32.xlu0 %v638_v17, %s1653_s22  ;;  %648 = vrot.lane.b32.xlu2 %v638_v17, %s1658_s0 }
 0x297   :  { %651 = vrot.lane.b32.xlu1 %v638_v17, %s1656_s6 }
 0x29e   :  { %663 = vrot.lane.b32.xlu0 %v638_v17, %s1650_s12  ;;  %657 = vrot.lane.b32.xlu2 %v638_v17, %s1644_s23 }
 0x29f   :  { %660 = vrot.lane.b32.xlu1 %v638_v17, %s2725_s25 }
 0x2a6   :  { %672 = vrot.lane.b32.xlu0 %v638_v17, %s1648_s2  ;;  %666 = vrot.lane.b32.xlu2 %v638_v17, %s1654_s26 }
 0x2a7   :  { %669 = vrot.lane.b32.xlu1 %v638_v17, %s1651_s20 }
 0x2ae   :  { %681 = vrot.lane.b32.xlu0 %v638_v17, %s1647_s5  ;;  %675 = vrot.lane.b32.xlu2 %v638_v17, %s1652_s21 }
 0x2af   :  { %678 = vrot.lane.b32.xlu1 %v638_v17, %s1649_s11 }
 0x2b6   :  { %726 = vrot.lane.b32.xlu2 %v719_v20, %s1655_s24  ;;  %723 = vrot.lane.b32.xlu0 %v719_v20, %s1657_s27 }
 0x2b7   :  { %720 = vrot.lane.b32.xlu1 %v719_v20, %s1659_s28 }
 0x2be   :  { %735 = vrot.lane.b32.xlu2 %v719_v20, %s1653_s22  ;;  %732 = vrot.lane.b32.xlu0 %v719_v20, %s1656_s6 }
 0x2bf   :  { %729 = vrot.lane.b32.xlu1 %v719_v20, %s1658_s0 }
 0x2c6   :  { %744 = vrot.lane.b32.xlu2 %v719_v20, %s1650_s12  ;;  %741 = vrot.lane.b32.xlu0 %v719_v20, %s2725_s25 }
 0x2c7   :  { %738 = vrot.lane.b32.xlu1 %v719_v20, %s1644_s23 }
 0x2ce   :  { %753 = vrot.lane.b32.xlu2 %v719_v20, %s1648_s2  ;;  %750 = vrot.lane.b32.xlu0 %v719_v20, %s1651_s20 }
 0x2cf   :  { %747 = vrot.lane.b32.xlu1 %v719_v20, %s1654_s26 }
 0x2d6   :  { %759 = vrot.lane.b32.xlu2 %v719_v20, %s1649_s11  ;;  %762 = vrot.lane.b32.xlu0 %v719_v20, %s1647_s5 }
 0x2d7   :  { %756 = vrot.lane.b32.xlu1 %v719_v20, %s1652_s21 }
 0x2e8   :  { %v643_v21 = vpop.permute.xlu2 %642 }
 0x2f0   :  { %v649_v23 = vpop.permute.xlu2 %648 }
 0x2f8   :  { %v658_v27 = vpop.permute.xlu2 %657 }
 0x300   :  { %v646_v24 = vpop.permute.xlu0 %645  ;;  %v667_v25 = vpop.permute.xlu2 %666 }
 0x301   :  { %v640_v26 = vpop.permute.xlu1 %639 }
 0x302   :  { %v685_v48 = vsel %vm2718_vm12, %v634_v16, %v640_v26 }
 0x303   :  { %v687_v38 = vsel %vm2719_vm13, %v685_v48, %v643_v21 }
 0x304   :  { %v689_v40 = vsel %vm2721_vm14, %v687_v38, %v646_v24 }
 0x305   :  { %v691_v45 = vsel %vm2720_vm15, %v689_v40, %v649_v23 }
 0x308   :  { %v655_v28 = vpop.permute.xlu0 %654  ;;  %v676_v32 = vpop.permute.xlu2 %675 }
 0x309   :  { %v652_v29 = vpop.permute.xlu1 %651 }
 0x30a   :  { %v693_v46 = vsel %vm2722_vm0, %v691_v45, %v652_v29 }
 0x30b   :  { %v695_v50 = vsel %vm694_vm1, %v693_v46, %v655_v28 }
 0x30c   :  { %v697_v54 = vsel %vm696_vm9, %v695_v50, %v658_v27 }
 0x310   :  { %v664_v30 = vpop.permute.xlu0 %663  ;;  %v727_v43 = vpop.permute.xlu2 %726 }
 0x311   :  { %v661_v31 = vpop.permute.xlu1 %660 }
 0x312   :  { %v698_v55 = vsel %vm2726_vm8, %v697_v54, %v661_v31 }
 0x313   :  { %v700_v59 = vsel %vm699_vm10, %v698_v55, %v664_v30 }
 0x314   :  { %v702_v62 = vsel %vm701_vm11, %v700_v59, %v667_v25 }
 0x318   :  { %v673_v42 = vpop.permute.xlu0 %672  ;;  %v736_v5 = vpop.permute.xlu2 %735 }
 0x319   :  { %v670_v33 = vpop.permute.xlu1 %669 }
 0x320   :  { %v682_v34 = vpop.permute.xlu0 %681  ;;  %v745_v58 = vpop.permute.xlu2 %744 }
 0x321   :  { %v679_v35 = vpop.permute.xlu1 %678 }
 0x328   :  { %v724_v39 = vpop.permute.xlu0 %723  ;;  %v754_v4 = vpop.permute.xlu2 %753 }
 0x329   :  { %v721_v41 = vpop.permute.xlu1 %720 }
 0x32a   :  { %v765_v49 = vsel %vm2718_vm12, %v636_v19, %v721_v41  ;;  %vm703_vm12 = vcmask 719872  }
 0x32b   :  { %v766_v52 = vsel %vm2719_vm13, %v765_v49, %v724_v39  ;;  %vm2723_vm13 = vcmask 785408   ;;  %v704_v63 = vsel %vm703_vm12, %v702_v62, %v670_v33 }
 0x32c   :  { %v767_v56 = vsel %vm2721_vm14, %v766_v52, %v727_v43  ;;  %v706_v2 = vsel %vm2723_vm13, %v704_v63, %v673_v42  ;;  %vm709_vm14 = vcmask 916480  }
 0x330   :  { %v733_v51 = vpop.permute.xlu0 %732  ;;  %v760_v22 = vpop.permute.xlu2 %759 }
 0x331   :  { %v730_v53 = vpop.permute.xlu1 %729 }
 0x332   :  { %v768_v57 = vsel %vm2720_vm15, %v767_v56, %v730_v53  ;;  %vm707_vm15 = vcmask 850944  }
 0x333   :  { %v769_v6 = vsel %vm2722_vm0, %v768_v57, %v733_v51  ;;  %v708_v7 = vsel %vm707_vm15, %v706_v2, %v676_v32  ;;  %vm711_vm0 = vcmask 982016  }
 0x334   :  { %v770_v0 = vsel %vm694_vm1, %v769_v6, %v736_v5  ;;  %v710_v10 = vsel %vm709_vm14, %v708_v7, %v679_v35 }
 0x335   :  { %v712_v14 = vsel %vm711_vm0, %v710_v10, %v682_v34 }
 0x336   :  { %v713_v15 = vperm.slane %v712_v14, 0 }
 0x338   :  { %v742_v60 = vpop.permute.xlu0 %741  ;;  %v714_v21 = vmul.f32 %v713_v15, %v2089_v36  ;;  %v715_v24 = vmul.f32 %v713_v15, %v2087_v47  ;;  %v716_v26 = vmul.f32 %v713_v15, %v2091_v37  ;;  %v717_v27 = vmul.f32 %v713_v15, %v2096_v44 }
 0x339   :  { %v739_v61 = vpop.permute.xlu1 %738 }
 0x33a   :  { %v771_v1 = vsel %vm696_vm9, %v770_v0, %v739_v61 }
 0x33b   :  { %v772_v3 = vsel %vm2726_vm8, %v771_v1, %v742_v60 }
 0x33c   :  { %v773_v11 = vsel %vm699_vm10, %v772_v3, %v745_v58 }
 0x340   :  { %v751_v8 = vpop.permute.xlu0 %750 }
 0x341   :  { %v748_v9 = vpop.permute.xlu1 %747 }
 0x342   :  { %v774_v12 = vsel %vm701_vm11, %v773_v11, %v748_v9  ;;  %vm2730_vm11 = vcmask 261120  }
 0x343   :  { %v775_v13 = vsel %vm703_vm12, %v774_v12, %v751_v8  ;;  %vm2724_vm12 = vcmask 1042432  }
 0x344   :  { %v776_v16 = vsel %vm2723_vm13, %v775_v13, %v754_v4  ;;  %vm2731_vm13 = vcmask 326656  }
 0x348   :  { %v763_v19 = vpop.permute.xlu0 %762 }
 0x349   :  { %v757_v17 = vpop.permute.xlu1 %756 }
 0x34a   :  { %v777_v18 = vsel %vm707_vm15, %v776_v16, %v757_v17  ;;  %vm2728_vm15 = vcmask 130048  }
 0x34b   :  { %v778_v20 = vsel %vm709_vm14, %v777_v18, %v760_v22  ;;  %vm2727_vm14 = vcmask 64512  }
 0x34c   :  { %v779_v23 = vsel %vm711_vm0, %v778_v20, %v763_v19  ;;  %vm2729_vm0 = vcmask 195584  }
 0x34d   :  { %v780_v28 = vperm.slane %v779_v23, 0 }
 0x34f   :  { %v781_v29 = vadd.f32 %v780_v28, %v714_v21  ;;  %v782_v25 = vadd.f32 %v780_v28, %v715_v24  ;;  %v783_v30 = vadd.f32 %v780_v28, %v716_v26  ;;  %v784_v31 = vadd.f32 %v780_v28, %v717_v27 }
 0x351   :  { %v785_v32 = vmax.f32 %v781_v29, 0.0  ;;  %v786_v42 = vmax.f32 %v782_v25, 0.0  ;;  %v787_v33 = vmax.f32 %v783_v30, 0.0  ;;  %v788_v34 = vmax.f32 %v784_v31, 0.0 }
 0x353   :  { %v793_v35 = vrot.slane %v785_v32, 1  ;;  %v794_v43 = vrot.slane %v786_v42, 1  ;;  %v796_v48 = vrot.slane %v787_v33, 1  ;;  %v798_v36 = vrot.slane %v788_v34, 1 }
 0x355   :  { %v795_v38 = vsel %vm121_vm4, %v793_v35, %v794_v43  ;;  %v799_v47 = vsel %vm121_vm4, %v796_v48, %v798_v36  ;;  %v797_v37 = vsel %vm121_vm4, %v794_v43, %v796_v48  ;;  %v807_v40 = vmax.f32 %v788_v34, %v798_v36 }
 0x356   :  { %v804_v44 = vmax.f32 %v785_v32, %v795_v38  ;;  %v806_v39 = vmax.f32 %v787_v33, %v799_v47  ;;  %v805_v41 = vmax.f32 %v786_v42, %v797_v37 }
 0x357   :  { %v832_v54 = vrot.slane %v807_v40, 4  ;;  %v834_v58 = vrot.slane %v807_v40, 5  ;;  %v836_v61 = vrot.slane %v807_v40, 6  ;;  %v838_v1 = vrot.slane %v807_v40, 7 }
 0x358   :  { %v825_v45 = vrot.slane %v806_v39, 1  ;;  %v827_v5 = vrot.slane %v806_v39, 2  ;;  %v809_v46 = vrot.slane %v804_v44, 1  ;;  %v811_v49 = vrot.slane %v804_v44, 2 }
 0x359   :  { %v829_v50 = vrot.slane %v806_v39, 3  ;;  %v813_v52 = vrot.slane %v804_v44, 3  ;;  %v816_v56 = vrot.slane %v805_v41, 4  ;;  %v818_v6 = vrot.slane %v805_v41, 5 }
 0x35a   :  { %v848_v51 = vsel %vm71_vm2, %v806_v39, %v825_v45  ;;  %v840_v53 = vsel %vm71_vm2, %v804_v44, %v809_v46  ;;  %v820_v63 = vrot.slane %v805_v41, 6  ;;  %v822_v3 = vrot.slane %v805_v41, 7 }
 0x35b   :  { %v849_v55 = vsel %vm103_vm3, %v848_v51, %v827_v5  ;;  %v841_v57 = vsel %vm103_vm3, %v840_v53, %v811_v49 }
 0x35c   :  { %v850_v59 = vsel %vm2724_vm12, %v849_v55, %v829_v50  ;;  %v843_v60 = vsel %vm2724_vm12, %v841_v57, %v813_v52  ;;  %vm2732_vm12 = vmmov %vm2727_vm14  ;;  %v1066_v55 = vld [vmem:[%s2709_s7 + $0x178] sm:$0xff] }
 0x35d   :  { %v851_v62 = vsel %vm139_vm7, %v850_v59, %v832_v54  ;;  %v844_v0 = vsel %vm139_vm7, %v843_v60, %v816_v56  ;;  %v1065_v56 = vld [vmem:[%s2709_s7 + $0x170] sm:$0xff]  ;;  %1145 = vmatpush.msrb.mxu3 %v1066_v55  ;;  %v1043_v55 = vld [vmem:[%s2709_s7 + $0xc0] sm:$0xff] }
 0x35e   :  { %v852_v2 = vsel %vm127_vm6, %v851_v62, %v834_v58  ;;  %v845_v4 = vsel %vm127_vm6, %v844_v0, %v818_v6 }
 0x35f   :  { %v853_v7 = vsel %vm112_vm5, %v852_v2, %v836_v61  ;;  %v846_v8 = vsel %vm112_vm5, %v845_v4, %v820_v63  ;;  %v1064_v61 = vld [vmem:[%s2709_s7 + $0x168] sm:$0xff]  ;;  %1146 = vmatpush.msrb.mxu3 %v1065_v56  ;;  %v2297_v2 = vld [vmem:[%s2709_s7 + $0x1f8] sm:$0xff]  ;;  %v1071_v56 = vld [vmem:[%s2709_s7 + $0x1a0] sm:$0xff] }
 0x360   :  { %v854_v9 = vsel %vm121_vm4, %v853_v7, %v838_v1  ;;  %v847_v10 = vsel %vm121_vm4, %v846_v8, %v822_v3  ;;  %v1063_v3 = vld [vmem:[%s2709_s7 + $0x160] sm:$0xff]  ;;  %1168 = vmatpush.msra.mxu0 %v2297_v2  ;;  %v1034_v4 = vld [vmem:[%s2709_s7 + $0x78] sm:$0xff]  ;;  %v2309_v7 = vld [vmem:[%s2709_s7 + $0x1f0] sm:$0xff] }
 0x361   :  { %859 = vrot.lane.b32.xlu1 %v854_v9, %s1647_s5  ;;  %857 = vrot.lane.b32.xlu2 %v847_v10, %s1647_s5 }
 0x362   :  { %1147 = vmatpush.msrb.mxu3 %v1064_v61  ;;  %1099 = vmatpush.msrb.mxu1 %v1034_v4  ;;  %v1022_v61 = vld [vmem:[%s2709_s7 + $0x18] sm:$0xff]  ;;  %v1067_v4 = vld [vmem:[%s2709_s7 + $0x180] sm:$0xff] }
 0x363   :  { %1169 = vmatpush.msra.mxu0 %v2309_v7 }
 0x364   :  { %1148 = vmatpush.msrb.mxu3 %v1063_v3  ;;  %v1039_v3 = vld [vmem:[%s2709_s7 + $0xa0] sm:$0xff] }
 0x3bb   :  { %v858_v11 = vpop.permute.xlu2 %857 }
 0x3bc   :  { %v863_v12 = vmax.f32 %v847_v10, %v858_v11 }
 0x3be   :  { %867 = vrot.lane.b32.xlu2 %v863_v12, %s1647_s5 }
 0x3d3   :  { %v860_v14 = vpop.permute.xlu1 %859 }
 0x3d4   :  { %v864_v13 = vmax.f32 %v854_v9, %v860_v14  ;;  %v1062_v14 = vld [vmem:[%s2709_s7 + $0x158] sm:$0xff] }
 0x3d5   :  { %1149 = vmatpush.msrb.mxu3 %v1062_v14  ;;  %v1035_v14 = vld [vmem:[%s2709_s7 + $0x80] sm:$0xff] }
 0x3d6   :  { %875 = vrot.lane.b32.xlu1 %v864_v13, %s1649_s11  ;;  %869 = vrot.lane.b32.xlu0 %v864_v13, %s1647_s5 }
 0x3d7   :  { %887 = vrot.lane.b32.xlu2 %v864_v13, %s1648_s2 }
 0x3de   :  { %881 = vrot.lane.b32.xlu0 %v864_v13, %s1652_s21  ;;  %873 = vrot.lane.b32.xlu1 %v863_v12, %s1649_s11 }
 0x3df   :  { %885 = vrot.lane.b32.xlu2 %v863_v12, %s1648_s2 }
 0x3e6   :  { %879 = vrot.lane.b32.xlu0 %v863_v12, %s1652_s21  ;;  %893 = vrot.lane.b32.xlu1 %v864_v13, %s1651_s20 }
 0x3e7   :  { %905 = vrot.lane.b32.xlu2 %v864_v13, %s1650_s12 }
 0x3ee   :  { %899 = vrot.lane.b32.xlu0 %v864_v13, %s1654_s26  ;;  %891 = vrot.lane.b32.xlu1 %v863_v12, %s1651_s20 }
 0x3f6   :  { %897 = vrot.lane.b32.xlu0 %v863_v12, %s1654_s26  ;;  %903 = vrot.lane.b32.xlu1 %v863_v12, %s1650_s12 }
 0x418   :  { %v868_v15 = vpop.permute.xlu2 %867 }
 0x419   :  { %v909_v42 = vsel %vm2732_vm12, %v863_v12, %v868_v15  ;;  %v2329_v15 = vld [vmem:[%s2709_s7 + $0x1e8] sm:$0xff] }
 0x41a   :  { %1170 = vmatpush.msra.mxu0 %v2329_v15 }
 0x431   :  { %v888_v22 = vpop.permute.xlu2 %887 }
 0x439   :  { %v886_v20 = vpop.permute.xlu2 %885 }
 0x441   :  { %v906_v31 = vpop.permute.xlu2 %905 }
 0x448   :  { %v876_v16 = vpop.permute.xlu1 %875  ;;  %v870_v17 = vpop.permute.xlu0 %869 }
 0x449   :  { %v910_v21 = vsel %vm2727_vm14, %v864_v13, %v870_v17  ;;  %vm2733_vm14 = vmmov %vm2728_vm15  ;;  %v1033_v13 = vld [vmem:[%s2709_s7 + $0x70] sm:$0xff]  ;;  %v1060_v17 = vld [vmem:[%s2709_s7 + $0x148] sm:$0xff] }
 0x44a   :  { %v912_v26 = vsel %vm2728_vm15, %v910_v21, %v876_v16  ;;  %vm2734_vm15 = vmmov %vm2729_vm0  ;;  %v1061_v16 = vld [vmem:[%s2709_s7 + $0x150] sm:$0xff]  ;;  %1100 = vmatpush.msrb.mxu1 %v1033_v13  ;;  %v1056_v21 = vld [vmem:[%s2709_s7 + $0x128] sm:$0xff] }
 0x44b   :  { %1150 = vmatpush.msrb.mxu3 %v1061_v16  ;;  %v1090_v13 = vld [vmem:[%s2709_s7 + $0x238] sm:$0xff]  ;;  %v1088_v16 = vld [vmem:[%s2709_s7 + $0x228] sm:$0xff] }
 0x44d   :  { %1151 = vmatpush.msrb.mxu3 %v1060_v17  ;;  %v1087_v17 = vld [vmem:[%s2709_s7 + $0x220] sm:$0xff] }
 0x450   :  { %v882_v18 = vpop.permute.xlu0 %881  ;;  %v874_v19 = vpop.permute.xlu1 %873 }
 0x451   :  { %v914_v27 = vsel %vm2729_vm0, %v912_v26, %v882_v18  ;;  %v911_v34 = vsel %vm2733_vm14, %v909_v42, %v874_v19  ;;  %vm2735_vm0 = vmmov %vm2730_vm11  ;;  %v1058_v18 = vld [vmem:[%s2709_s7 + $0x138] sm:$0xff]  ;;  %v1057_v19 = vld [vmem:[%s2709_s7 + $0x130] sm:$0xff] }
 0x452   :  { %v916_v28 = vsel %vm2730_vm11, %v914_v27, %v888_v22  ;;  %vm2736_vm11 = vmmov %vm2731_vm13  ;;  %v1059_v22 = vld [vmem:[%s2709_s7 + $0x140] sm:$0xff]  ;;  %v1078_v42 = vld [vmem:[%s2709_s7 + $0x1d8] sm:$0xff] }
 0x453   :  { %1152 = vmatpush.msrb.mxu3 %v1059_v22 }
 0x455   :  { %1153 = vmatpush.msrb.mxu3 %v1058_v18  ;;  %v1086_v18 = vld [vmem:[%s2709_s7 + $0x218] sm:$0xff] }
 0x457   :  { %1154 = vmatpush.msrb.mxu3 %v1057_v19  ;;  %v1085_v19 = vld [vmem:[%s2709_s7 + $0x210] sm:$0xff] }
 0x458   :  { %v880_v23 = vpop.permute.xlu0 %879  ;;  %v894_v24 = vpop.permute.xlu1 %893 }
 0x459   :  { %v918_v29 = vsel %vm2731_vm13, %v916_v28, %v894_v24  ;;  %v913_v35 = vsel %vm2734_vm15, %v911_v34, %v880_v23  ;;  %vm2737_vm13 = vmmov %vm2732_vm12  ;;  %v1055_v24 = vld [vmem:[%s2709_s7 + $0x120] sm:$0xff]  ;;  %1155 = vmatpush.msrb.mxu3 %v1056_v21  ;;  %v1030_v34 = vld [vmem:[%s2709_s7 + $0x58] sm:$0xff] }
 0x45a   :  { %v915_v43 = vsel %vm2735_vm0, %v913_v35, %v886_v20  ;;  %v1049_v35 = vld [vmem:[%s2709_s7 + $0xf0] sm:$0xff]  ;;  %v1083_v21 = vld [vmem:[%s2709_s7 + $0x200] sm:$0xff]  ;;  %vm2738_vm0 = vmmov %vm2732_vm12 }
 0x45b   :  { %1156 = vmatpush.msrb.mxu3 %v1055_v24 }
 0x460   :  { %v900_v25 = vpop.permute.xlu0 %899  ;;  %v892_v30 = vpop.permute.xlu1 %891 }
 0x461   :  { %v920_v32 = vsel %vm694_vm1, %v918_v29, %v900_v25  ;;  %v917_v48 = vsel %vm2736_vm11, %v915_v43, %v892_v30  ;;  %v1032_v29 = vld [vmem:[%s2709_s7 + $0x68] sm:$0xff]  ;;  %v1079_v25 = vld [vmem:[%s2709_s7 + $0x1e0] sm:$0xff]  ;;  %v1054_v30 = vld [vmem:[%s2709_s7 + $0x118] sm:$0xff]  ;;  %vm2739_vm11 = vcmask 130048  }
 0x462   :  { %v922_v33 = vsel %vm696_vm9, %v920_v32, %v906_v31  ;;  %1101 = vmatpush.msrb.mxu1 %v1032_v29  ;;  %1171 = vmatpush.msra.mxu0 %v1079_v25  ;;  %v1031_v31 = vld [vmem:[%s2709_s7 + $0x60] sm:$0xff]  ;;  %v1050_v32 = vld [vmem:[%s2709_s7 + $0xf8] sm:$0xff]  ;;  %v1077_v43 = vld [vmem:[%s2709_s7 + $0x1d0] sm:$0xff] }
 0x463   :  { %935 = vrot.lane.b32.xlu2 %v922_v33, %s1659_s28  ;;  %1157 = vmatpush.msrb.mxu3 %v1054_v30  ;;  %v1053_v33 = vld [vmem:[%s2709_s7 + $0x110] sm:$0xff] }
 0x464   :  { %1122 = vmatpush.msrb.mxu2 %v1050_v32  ;;  %1102 = vmatpush.msrb.mxu1 %v1031_v31 }
 0x465   :  { %1172 = vmatpush.msra.mxu0 %v1078_v42  ;;  %1158 = vmatpush.msrb.mxu3 %v1053_v33 }
 0x466   :  { %1123 = vmatpush.msrb.mxu2 %v1049_v35  ;;  %1103 = vmatpush.msrb.mxu1 %v1030_v34 }
 0x467   :  { %1173 = vmatpush.msra.mxu0 %v1077_v43 }
 0x468   :  { %v898_v36 = vpop.permute.xlu0 %897  ;;  %v904_v38 = vpop.permute.xlu1 %903 }
 0x469   :  { %v919_v47 = vsel %vm694_vm1, %v917_v48, %v898_v36  ;;  %v1052_v48 = vld [vmem:[%s2709_s7 + $0x108] sm:$0xff]  ;;  %v1029_v36 = vld [vmem:[%s2709_s7 + $0x50] sm:$0xff] }
 0x46a   :  { %v921_v37 = vsel %vm696_vm9, %v919_v47, %v904_v38  ;;  %v1048_v38 = vld [vmem:[%s2709_s7 + $0xe8] sm:$0xff]  ;;  %1159 = vmatpush.msrb.mxu3 %v1052_v48  ;;  %1104 = vmatpush.msrb.mxu1 %v1029_v36 }
 0x46b   :  { %924 = vrot.lane.b32.xlu0 %v921_v37, %s1659_s28  ;;  %v1076_v47 = vld [vmem:[%s2709_s7 + $0x1c8] sm:$0xff]  ;;  %v1051_v37 = vld [vmem:[%s2709_s7 + $0x100] sm:$0xff]  ;;  %1124 = vmatpush.msrb.mxu2 %v1048_v38 }
 0x46c   :  { %1174 = vmatpush.msra.mxu0 %v1076_v47  ;;  %1160 = vmatpush.msrb.mxu3 %v1051_v37 }
 0x46e   :  { %1514 = vmatpush.msra.mxu3 %v2297_v2  ;;  %v1020_v2 = vld [vmem:[%s2709_s7 + $0x8] sm:$0xff] }
 0x470   :  { %1515 = vmatpush.msra.mxu3 %v2309_v7  ;;  %v1019_v7 = vld [vmem:[%s2709_s7] sm:$0xff] }
 0x472   :  { %1516 = vmatpush.msra.mxu3 %v2329_v15  ;;  %v1089_v15 = vld [vmem:[%s2709_s7 + $0x230] sm:$0xff] }
 0x474   :  { %1517 = vmatpush.msra.mxu3 %v1079_v25 }
 0x476   :  { %1518 = vmatpush.msra.mxu3 %v1078_v42 }
 0x478   :  { %1519 = vmatpush.msra.mxu3 %v1077_v43 }
 0x47a   :  { %1520 = vmatpush.msra.mxu3 %v1076_v47 }
 0x4bd   :  { %v936_v44 = vpop.permute.xlu2 %935 }
 0x4be   :  { %v938_v39 = vsel %vm2737_vm13, 0.0, %v936_v44  ;;  %v1028_v44 = vld [vmem:[%s2709_s7 + $0x48] sm:$0xff]  ;;  %vm2740_vm13 = vcmask 195584  }
 0x4bf   :  { %v939_v40 = vsel %vm699_vm10, %v938_v39, 0.0  ;;  %v1047_v39 = vld [vmem:[%s2709_s7 + $0xe0] sm:$0xff]  ;;  %1105 = vmatpush.msrb.mxu1 %v1028_v44 }
 0x4c0   :  { %v941_v41 = vrot.slane %v939_v40, 7  ;;  %v1075_v40 = vld [vmem:[%s2709_s7 + $0x1c0] sm:$0xff]  ;;  %1125 = vmatpush.msrb.mxu2 %v1047_v39 }
 0x4c1   :  { %1175 = vmatpush.msra.mxu0 %v1075_v40  ;;  %1521 = vmatpush.msra.mxu3 %v1075_v40 }
 0x4c2   :  { %v943_v45 = vsel %vm71_vm2, 0.0, %v941_v41  ;;  %v944_v5 = vsel %vm71_vm2, %v941_v41, 0.0  ;;  %v1027_v41 = vld [vmem:[%s2709_s7 + $0x40] sm:$0xff] }
 0x4c3   :  { %v947_v46 = vrot.slane %v943_v45, 6  ;;  %v948_v49 = vrot.slane %v944_v5, 6  ;;  %v1046_v45 = vld [vmem:[%s2709_s7 + $0xd8] sm:$0xff]  ;;  %1106 = vmatpush.msrb.mxu1 %v1027_v41 }
 0x4c4   :  { %v1074_v5 = vld [vmem:[%s2709_s7 + $0x1b8] sm:$0xff]  ;;  %1126 = vmatpush.msrb.mxu2 %v1046_v45 }
 0x4c5   :  { %v949_v53 = vsel %vm103_vm3, %v947_v46, %v948_v49  ;;  %v1026_v49 = vld [vmem:[%s2709_s7 + $0x38] sm:$0xff]  ;;  %1176 = vmatpush.msra.mxu0 %v1074_v5  ;;  %1522 = vmatpush.msra.mxu3 %v1074_v5 }
 0x4c6   :  { %v962_v60 = vrot.slane %v949_v53, 3  ;;  %v954_v1 = vrot.slane %v949_v53, 2  ;;  %v968_v23 = vrot.slane %v949_v53, 4  ;;  %1107 = vmatpush.msrb.mxu1 %v1026_v49  ;;  %v1072_v53 = vld [vmem:[%s2709_s7 + $0x1a8] sm:$0xff] }
 0x4dd   :  { %v925_v50 = vpop.permute.xlu0 %924 }
 0x4de   :  { %v927_v51 = vsel %vm2732_vm12, 0.0, %v925_v50  ;;  %v1073_v50 = vld [vmem:[%s2709_s7 + $0x1b0] sm:$0xff]  ;;  %vm2741_vm12 = vcmask 261120  }
 0x4df   :  { %v928_v52 = vsel %vm699_vm10, %v927_v51, 0.0  ;;  %v1044_v51 = vld [vmem:[%s2709_s7 + $0xc8] sm:$0xff]  ;;  %1177 = vmatpush.msra.mxu0 %v1073_v50  ;;  %1523 = vmatpush.msra.mxu3 %v1073_v50 }
 0x4e0   :  { %v930_v54 = vrot.slane %v928_v52, 7  ;;  %v1025_v52 = vld [vmem:[%s2709_s7 + $0x30] sm:$0xff] }
 0x4e1   :  { %1108 = vmatpush.msrb.mxu1 %v1025_v52  ;;  %1178 = vmatpush.msra.mxu0 %v1072_v53 }
 0x4e2   :  { %v2286_v57 = vsel %vm71_vm2, 0.0, %v930_v54  ;;  %v933_v58 = vsel %vm71_vm2, %v930_v54, 0.0  ;;  %v1024_v54 = vld [vmem:[%s2709_s7 + $0x28] sm:$0xff]  ;;  %1524 = vmatpush.msra.mxu3 %v1072_v53 }
 0x4e3   :  { %v951_v59 = vsel %vm103_vm3, %v933_v58, %v947_v46  ;;  %v958_v6 = vrot.slane %v2286_v57, 1  ;;  %v964_v27 = vrot.slane %v2286_v57, 2  ;;  %v1045_v46 = vld [vmem:[%s2709_s7 + $0xd0] sm:$0xff]  ;;  %v1023_v58 = vld [vmem:[%s2709_s7 + $0x20] sm:$0xff]  ;;  %1109 = vmatpush.msrb.mxu1 %v1024_v54  ;;  %1179 = vmatpush.msra.mxu0 %v1071_v56 }
 0x4e4   :  { %v953_v62 = vrot.slane %v951_v59, 2  ;;  %v961_v63 = vrot.slane %v951_v59, 3  ;;  %v959_v0 = vrot.slane %v951_v59, 1  ;;  %v967_v20 = vrot.slane %v951_v59, 4  ;;  %1127 = vmatpush.msrb.mxu2 %v1045_v46  ;;  %v1042_v59 = vld [vmem:[%s2709_s7 + $0xb8] sm:$0xff]  ;;  %1525 = vmatpush.msra.mxu3 %v1071_v56 }
 0x4e5   :  { %1110 = vmatpush.msrb.mxu1 %v1023_v58 }
 0x4e6   :  { %v960_v8 = vsel %vm121_vm4, %v958_v6, %v959_v0  ;;  %v963_v9 = vsel %vm127_vm6, %v961_v63, %v962_v60  ;;  %v2314_v10 = vsel %vm112_vm5, %v953_v62, %v954_v1  ;;  %v2360_v26 = vsel %vm139_vm7, %v967_v20, %v968_v23  ;;  %1128 = vmatpush.msrb.mxu2 %v1044_v51  ;;  %v1070_v6 = vld [vmem:[%s2709_s7 + $0x198] sm:$0xff]  ;;  %v1041_v60 = vld [vmem:[%s2709_s7 + $0xb0] sm:$0xff]  ;;  %v1040_v0 = vld [vmem:[%s2709_s7 + $0xa8] sm:$0xff] }
 0x4e7   :  { %995 = vrot.lane.b32.xlu0 %v960_v8, %s1653_s22  ;;  %v1604_v11 = vpack.i.bf16 %v963_v9, %v960_v8  ;;  %v1599_v12 = vpack.i.bf16 %v2314_v10, %v2286_v57  ;;  %v2371_v28 = vsel %vm112_vm5, %v964_v27, %v953_v62  ;;  %v1069_v62 = vld [vmem:[%s2709_s7 + $0x190] sm:$0xff]  ;;  %1180 = vmatpush.msra.mxu0 %v1070_v6  ;;  %v1068_v1 = vld [vmem:[%s2709_s7 + $0x188] sm:$0xff] }
 0x4e8   :  { %1129 = vmatpush.msrb.mxu2 %v1043_v55  ;;  %1111 = vmatpush.msrb.mxu1 %v1022_v61  ;;  %v1021_v63 = vld [vmem:[%s2709_s7 + $0x10] sm:$0xff]  ;;  %v1084_v20 = vld [vmem:[%s2709_s7 + $0x208] sm:$0xff] }
 0x4e9   :  { %1605 = vrot.lane.b32.xlu2 %v1604_v11, %s1647_s5  ;;  %1600 = vrot.lane.b32.xlu1 %v1599_v12, %s1644_s23  ;;  %v1036_v11 = vld [vmem:[%s2709_s7 + $0x88] sm:$0xff] }
 0x4ea   :  { %1130 = vmatpush.msrb.mxu2 %v1042_v59  ;;  %1181 = vmatpush.msra.mxu0 %v1069_v62 }
 0x4eb   :  { %1112 = vmatpush.msrb.mxu1 %v1021_v63  ;;  %1526 = vmatpush.msra.mxu3 %v1070_v6 }
 0x4ec   :  { %1131 = vmatpush.msrb.mxu2 %v1041_v60  ;;  %1182 = vmatpush.msra.mxu0 %v1068_v1 }
 0x4ed   :  { %1113 = vmatpush.msrb.mxu1 %v1020_v2  ;;  %1527 = vmatpush.msra.mxu3 %v1069_v62 }
 0x4ee   :  { %1132 = vmatpush.msrb.mxu2 %v1040_v0  ;;  %1183 = vmatpush.msra.mxu0 %v1067_v4 }
 0x4ef   :  { %997 = vrot.lane.b32.xlu0 %v963_v9, %s1653_s22  ;;  %1114 = vmatpush.msrb.mxu1 %v1019_v7 }
 0x4f0   :  { %1133 = vmatpush.msrb.mxu2 %v1039_v3  ;;  %1528 = vmatpush.msra.mxu3 %v1068_v1 }
 0x4f1   :  { %983 = vrot.lane.b32.xlu2 %v960_v8, %s2725_s25  ;;  %977 = vrot.lane.b32.xlu1 %v2286_v57, %s1649_s11  ;;  %v1038_v8 = vld [vmem:[%s2709_s7 + $0x98] sm:$0xff] }
 0x4f2   :  { %1134 = vmatpush.msrb.mxu2 %v1038_v8  ;;  %1199 = vmatpush.msra.mxu1 %v1090_v13 }
 0x4f3   :  { %1529 = vmatpush.msra.mxu3 %v1067_v4 }
 0x4f4   :  { %1200 = vmatpush.msra.mxu1 %v1089_v15 }
 0x4f6   :  { %1201 = vmatpush.msra.mxu1 %v1088_v16 }
 0x4f7   :  { %1003 = vrot.lane.b32.xlu0 %v2360_v26, %s1644_s23 }
 0x4f8   :  { %1202 = vmatpush.msra.mxu1 %v1087_v17 }
 0x4f9   :  { %985 = vrot.lane.b32.xlu2 %v963_v9, %s2725_s25  ;;  %979 = vrot.lane.b32.xlu1 %v2314_v10, %s1649_s11  ;;  %v1037_v9 = vld [vmem:[%s2709_s7 + $0x90] sm:$0xff] }
 0x4fa   :  { %1135 = vmatpush.msrb.mxu2 %v1037_v9  ;;  %1203 = vmatpush.msra.mxu1 %v1086_v18 }
 0x4fc   :  { %1136 = vmatpush.msrb.mxu2 %v1036_v11  ;;  %1204 = vmatpush.msra.mxu1 %v1085_v19 }
 0x4fe   :  { %1137 = vmatpush.msrb.mxu2 %v1035_v14  ;;  %1205 = vmatpush.msra.mxu1 %v1084_v20 }
 0x4ff   :  { %1009 = vrot.lane.b32.xlu0 %v2360_v26, %s1649_s11 }
 0x500   :  { %1206 = vmatpush.msra.mxu1 %v1083_v21 }
 0x501   :  { %1001 = vrot.lane.b32.xlu2 %v2371_v28, %s1644_s23  ;;  %1007 = vrot.lane.b32.xlu1 %v2371_v28, %s1649_s11 }
 0x543   :  { %v1606_v12 = vpop.permute.xlu2 %1605 }
 0x544   :  { %v1607_v24 = vunpack.i.l.bf16 %v1606_v12  ;;  %v1608_v33 = vunpack.i.h.bf16 %v1606_v12 }
 0x54b   :  { %v984_v22 = vpop.permute.xlu2 %983 }
 0x553   :  { %v986_v23 = vpop.permute.xlu2 %985 }
 0x559   :  { %v996_v27 = vpop.permute.xlu0 %995 }
 0x55a   :  { %v1015_v29 = vsel %vm2726_vm8, %v1607_v24, %v996_v27 }
 0x55b   :  { %v1002_v25 = vpop.permute.xlu2 %1001  ;;  %1161 = vmatmul.f32.vlgmr.msrb.gmra.mxu3 %v1015_v29  ;;  %v1601_v30 = vpop.permute.xlu1 %1600 }
 0x55c   :  { %v1017_v31 = vsel %vm2726_vm8, %v2371_v28, %v1002_v25  ;;  %v1602_v32 = vunpack.i.l.bf16 %v1601_v30  ;;  %v1603_v35 = vunpack.i.h.bf16 %v1601_v30 }
 0x55d   :  { %1184 = vmatmul.f32.vlgmr.msra.gmra.mxu0 %v1017_v31 }
 0x55e   :  { %v1011_v42 = vsel %vm2726_vm8, %v2286_v57, %v1602_v32  ;;  %v1012_v38 = vsel %vm2726_vm8, %v2314_v10, %v1603_v35  ;;  %v1610_v10 = vld [vmem:[%s2710_s8] ss:$0 sm:$0xff] }
 0x55f   :  { %1115 = vmatmul.f32.vlgmr.msrb.gmra.mxu1 %v1011_v42 }
 0x561   :  { %v998_v34 = vpop.permute.xlu0 %997 }
 0x562   :  { %v1016_v43 = vsel %vm2726_vm8, %v1608_v33, %v998_v34 }
 0x563   :  { %1164 = vmatmul.f32.gmra.mxu3 %v1016_v43  ;;  %v978_v48 = vpop.permute.xlu1 %977 }
 0x564   :  { %v1013_v36 = vsel %vm2726_vm8, %v978_v48, %v984_v22 }
 0x565   :  { %1138 = vmatmul.f32.vlgmr.msrb.gmra.mxu2 %v1013_v36 }
 0x567   :  { %1118 = vmatmul.f32.gmra.mxu1 %v1012_v38 }
 0x569   :  { %v1004_v28 = vpop.permute.xlu0 %1003 }
 0x56a   :  { %v1018_v47 = vsel %vm2726_vm8, %v2360_v26, %v1004_v28 }
 0x56b   :  { %1187 = vmatmul.f32.vlgmr.msra.gmra.mxu3 %v1018_v47  ;;  %v980_v57 = vpop.permute.xlu1 %979 }
 0x56c   :  { %v1014_v37 = vsel %vm2726_vm8, %v980_v57, %v986_v23 }
 0x56d   :  { %1141 = vmatmul.f32.gmra.mxu2 %v1014_v37 }
 0x571   :  { %v1010_v39 = vpop.permute.xlu0 %1009 }
 0x573   :  { %v1008_v44 = vpop.permute.xlu1 %1007 }
 0x574   :  { %1512 = vmatmul.msk.f32.vlgmr.msra.gmra.mxu1 %vm2726_vm8, %v1008_v44 }
 0x57c   :  { %1513 = vmatmul.msk.f32.gmra.mxu1 %vm2726_vm8, %v1010_v39 }
 0x5da   :  { %v1185_v55 = vpop.f32.mrf.mxu0 }
 0x5dc   :  { %v1116_v40 = vpop.f32.mrf.mxu1 }
 0x5dd   :  { %v1117_v26 = vadd.f32 %v1610_v10, %v1116_v40 }
 0x5de   :  { %v1162_v41 = vpop.f32.mrf.mxu3 }
 0x5e4   :  { %v1119_v5 = vpop.f32.mrf.mxu1 }
 0x5e5   :  { %v1120_v50 = vadd.f32 %v1610_v10, %v1119_v5 }
 0x5e6   :  { %v1165_v49 = vpop.f32.mrf.mxu3 }
 0x5e8   :  { %v1139_v45 = vpop.f32.mrf.mxu2 }
 0x5e9   :  { %v1140_v46 = vadd.f32 %v1139_v45, %v1117_v26 }
 0x5eb   :  { %v1163_v51 = vadd.f32 %v1162_v41, %v1140_v46 }
 0x5ed   :  { %v1186_v58 = vadd.f32 %v1185_v55, %v1163_v51 }
 0x5ee   :  { %v1188_v6 = vpop.f32.mrf.mxu3 }
 0x5f0   :  { %v1142_v52 = vpop.f32.mrf.mxu2 }
 0x5f1   :  { %v1143_v53 = vadd.f32 %v1142_v52, %v1120_v50  ;;  %v1208_v54 = vpop.f32.mrf.mxu1 }
 0x5f2   :  { %v2562_v59 = vadd.f32 %v1208_v54, %v1186_v58  ;;  %v1214_v58 = vld [vmem:[%s2711_s9] sm:$0x1] }
 0x5f3   :  { %v1166_v56 = vadd.f32 %v1165_v49, %v1143_v53 }
 0x5f4   :  { %v1255_v62 = vmul.f32 %v2562_v59, %v2562_v59  ;;  %v1216_v0 = vsel %vm2726_vm8, %v2562_v59, 0.0 }
 0x5f5   :  { %v1189_v60 = vadd.f32 %v1188_v6, %v1166_v56 }
 0x5f6   :  { %v1257_v4 = vsel %vm2726_vm8, %v1255_v62, 0.0 }
 0x5f9   :  { %v1211_v61 = vpop.f32.mrf.mxu1 }
 0x5fa   :  { %v2566_v63 = vadd.f32 %v1211_v61, %v1189_v60 }
 0x5fc   :  { %v1217_v1 = vsel %vm2726_vm8, %v2566_v63, 0.0  ;;  %v1256_v2 = vmul.f32 %v2566_v63, %v2566_v63 }
 0x5fd   :  { %v1218_v3 = vadd.f32 %v1217_v1, %v1216_v0  ;;  %v1215_v1 = vld [vmem:[%s2712_s10] sm:$0x1] }
 0x5fe   :  { %v1258_v7 = vsel %vm2726_vm8, %v1256_v2, 0.0  ;;  %vm2745_vm8 = vmmov %vm2740_vm13 }
 0x5ff   :  { %v1219_v8 = vrot.slane %v1218_v3, 4  ;;  %v1259_v9 = vadd.f32 %v1258_v7, %v1257_v4 }
 0x601   :  { %v1220_v11 = vadd.f32 %v1219_v8, %v1218_v3  ;;  %v1260_v12 = vrot.slane %v1259_v9, 4 }
 0x603   :  { %v1221_v14 = vrot.slane %v1220_v11, 2  ;;  %v1261_v13 = vadd.f32 %v1260_v12, %v1259_v9 }
 0x605   :  { %v1222_v15 = vadd.f32 %v1221_v14, %v1220_v11  ;;  %v1262_v16 = vrot.slane %v1261_v13, 2 }
 0x607   :  { %v1223_v17 = vrot.slane %v1222_v15, 1  ;;  %v1263_v18 = vadd.f32 %v1262_v16, %v1261_v13 }
 0x609   :  { %v1224_v22 = vadd.f32 %v1223_v17, %v1222_v15  ;;  %v1264_v19 = vrot.slane %v1263_v18, 1 }
 0x60b   :  { %1238 = vrot.lane.b32.xlu0 %v1224_v22, %s1648_s2  ;;  %1230 = vrot.lane.b32.xlu2 %v1224_v22, %s1649_s11  ;;  %v1265_v20 = vadd.f32 %v1264_v19, %v1263_v18 }
 0x60c   :  { %1226 = vrot.lane.b32.xlu1 %v1224_v22, %s1647_s5 }
 0x613   :  { %1267 = vrot.lane.b32.xlu0 %v1265_v20, %s1647_s5  ;;  %1242 = vrot.lane.b32.xlu2 %v1224_v22, %s1651_s20 }
 0x614   :  { %1234 = vrot.lane.b32.xlu1 %v1224_v22, %s1652_s21 }
 0x61b   :  { %1279 = vrot.lane.b32.xlu0 %v1265_v20, %s1648_s2  ;;  %1271 = vrot.lane.b32.xlu2 %v1265_v20, %s1649_s11 }
 0x61c   :  { %1246 = vrot.lane.b32.xlu1 %v1224_v22, %s1654_s26 }
 0x623   :  { %1250 = vrot.lane.b32.xlu0 %v1224_v22, %s1650_s12  ;;  %1283 = vrot.lane.b32.xlu2 %v1265_v20, %s1651_s20 }
 0x624   :  { %1275 = vrot.lane.b32.xlu1 %v1265_v20, %s1652_s21 }
 0x62b   :  { %1291 = vrot.lane.b32.xlu2 %v1265_v20, %s1650_s12 }
 0x62c   :  { %1287 = vrot.lane.b32.xlu1 %v1265_v20, %s1654_s26 }
 0x665   :  { %v1231_v21 = vpop.permute.xlu2 %1230 }
 0x66d   :  { %v1243_v27 = vpop.permute.xlu2 %1242 }
 0x675   :  { %v1272_v31 = vpop.permute.xlu2 %1271 }
 0x67d   :  { %v1239_v23 = vpop.permute.xlu0 %1238  ;;  %v1284_v36 = vpop.permute.xlu2 %1283 }
 0x67e   :  { %v1227_v24 = vpop.permute.xlu1 %1226 }
 0x67f   :  { %v1229_v30 = vadd.f32 %v1227_v24, %v1224_v22 }
 0x681   :  { %v1233_v32 = vadd.f32 %v1231_v21, %v1229_v30 }
 0x685   :  { %v1268_v29 = vpop.permute.xlu0 %1267  ;;  %v1292_v5 = vpop.permute.xlu2 %1291 }
 0x686   :  { %v1235_v25 = vpop.permute.xlu1 %1234  ;;  %v1270_v35 = vadd.f32 %v1268_v29, %v1265_v20 }
 0x687   :  { %v1237_v34 = vadd.f32 %v1235_v25, %v1233_v32 }
 0x688   :  { %v1274_v48 = vadd.f32 %v1272_v31, %v1270_v35 }
 0x689   :  { %v1241_v43 = vadd.f32 %v1239_v23, %v1237_v34 }
 0x68b   :  { %v1245_v28 = vadd.f32 %v1243_v27, %v1241_v43 }
 0x68d   :  { %v1280_v42 = vpop.permute.xlu0 %1279 }
 0x68e   :  { %v1247_v33 = vpop.permute.xlu1 %1246 }
 0x68f   :  { %v1249_v37 = vadd.f32 %v1247_v33, %v1245_v28 }
 0x695   :  { %v1251_v57 = vpop.permute.xlu0 %1250 }
 0x696   :  { %v1276_v38 = vpop.permute.xlu1 %1275  ;;  %v1253_v39 = vadd.f32 %v1251_v57, %v1249_v37 }
 0x697   :  { %v1278_v47 = vadd.f32 %v1276_v38, %v1274_v48 }
 0x698   :  { %v1254_v10 = vmul.f32 0.0078125, %v1253_v39 }
 0x699   :  { %v1282_v44 = vadd.f32 %v1280_v42, %v1278_v47 }
 0x69a   :  { %v1296_v46 = vmul.f32 %v1254_v10, %v1254_v10 }
 0x69b   :  { %v1286_v40 = vadd.f32 %v1284_v36, %v1282_v44 }
 0x69e   :  { %v1288_v41 = vpop.permute.xlu1 %1287 }
 0x69f   :  { %v1290_v45 = vadd.f32 %v1288_v41, %v1286_v40 }
 0x6a1   :  { %v1294_v26 = vadd.f32 %v1292_v5, %v1290_v45 }
 0x6a3   :  { %v1295_v49 = vmul.f32 0.0078125, %v1294_v26 }
 0x6a5   :  { %v1297_v50 = vsub.f32 %v1295_v49, %v1296_v46 }
 0x6a7   :  { %v1298_v51 = vadd.f32 1e-05, %v1297_v50 }
 0x6a9   :  { %1614 = vrsqrt.f32 %v1298_v51  ;;  %vm1305_vm14 = vweird.f32 %v1298_v51 }
 0x6af   :  { %v1615_v52 = vpop.eup %1614 }
 0x6b0   :  { %v1300_v53 = vmul.f32 %v1615_v52, %v1298_v51  ;;  %vm1306_vm10 = vweird.f32 %v1615_v52 }
 0x6b1   :  { %vm1307_vm15 = vmor %vm1305_vm14, %vm1306_vm10  ;;  %vm2743_vm14 = vcmask 326656  }
 0x6b2   :  { %v1301_v54 = vmul.f32 %v1615_v52, %v1300_v53  ;;  %vm2742_vm10 = vmmov %vm2738_vm0 }
 0x6b4   :  { %v1302_v55 = vmul.f32 0.5, %v1301_v54 }
 0x6b6   :  { %v1303_v56 = vsub.f32 1.5, %v1302_v55 }
 0x6b8   :  { %v1304_v6 = vmul.f32 %v1615_v52, %v1303_v56 }
 0x6ba   :  { %v1308_v60 = vsel %vm1307_vm15, %v1615_v52, %v1304_v6  ;;  %vm2744_vm15 = vmmov %vm2739_vm11 }
 0x6bb   :  { %v1309_v61 = vmul.f32 %v1308_v60, %v1214_v58  ;;  %v1465_v60 = vld [vmem:[%s2715_s13 + $0x78] sm:$0xff] }
 0x6bc   :  { %1470 = vmatpush.msra.mxu2 %v1465_v60 }
 0x6bd   :  { %v1313_v62 = vperm.slane %v1309_v61, 0  ;;  %v1310_v0 = vmul.f32 %v1309_v61, %v1254_v10 }
 0x6bf   :  { %1320 = vrot.lane.b32.xlu2 %v1313_v62, %s1655_s24  ;;  %1317 = vrot.lane.b32.xlu1 %v1313_v62, %s1657_s27  ;;  %v1311_v2 = vsub.f32 %v1215_v1, %v1310_v0 }
 0x6c0   :  { %1314 = vrot.lane.b32.xlu0 %v1313_v62, %s1659_s28 }
 0x6c1   :  { %v1346_v3 = vperm.slane %v1311_v2, 0 }
 0x6c7   :  { %1329 = vrot.lane.b32.xlu2 %v1313_v62, %s1653_s22  ;;  %1323 = vrot.lane.b32.xlu1 %v1313_v62, %s1658_s0 }
 0x6c8   :  { %1326 = vrot.lane.b32.xlu0 %v1313_v62, %s1656_s6 }
 0x6cf   :  { %1332 = vrot.lane.b32.xlu1 %v1313_v62, %s1644_s23  ;;  %1350 = vrot.lane.b32.xlu2 %v1346_v3, %s1657_s27 }
 0x6d0   :  { %1347 = vrot.lane.b32.xlu0 %v1346_v3, %s1659_s28 }
 0x6d7   :  { %1353 = vrot.lane.b32.xlu1 %v1346_v3, %s1655_s24  ;;  %1359 = vrot.lane.b32.xlu2 %v1346_v3, %s1656_s6 }
 0x6d8   :  { %1356 = vrot.lane.b32.xlu0 %v1346_v3, %s1658_s0 }
 0x6df   :  { %1365 = vrot.lane.b32.xlu1 %v1346_v3, %s1644_s23  ;;  %s2752_s23 = smov 64  }
 0x6e0   :  { %1362 = vrot.lane.b32.xlu0 %v1346_v3, %s1653_s22 }
 0x719   :  { %v1321_v8 = vpop.permute.xlu2 %1320 }
 0x721   :  { %v1330_v12 = vpop.permute.xlu2 %1329 }
 0x729   :  { %v1351_v22 = vpop.permute.xlu2 %1350 }
 0x731   :  { %v1318_v4 = vpop.permute.xlu1 %1317  ;;  %v1360_v31 = vpop.permute.xlu2 %1359 }
 0x732   :  { %v1315_v7 = vpop.permute.xlu0 %1314 }
 0x733   :  { %v1335_v14 = vsel %vm2738_vm0, %v1309_v61, %v1315_v7  ;;  %vm2746_vm0 = vmmov %vm2741_vm12 }
 0x734   :  { %v1336_v16 = vsel %vm2739_vm11, %v1335_v14, %v1318_v4  ;;  %vm2747_vm11 = vmmov %vm2743_vm14  ;;  %v1461_v14 = vld [vmem:[%s2715_s13 + $0x58] sm:$0xff] }
 0x735   :  { %v1337_v17 = vsel %vm2740_vm13, %v1336_v16, %v1321_v8  ;;  %v1458_v16 = vld [vmem:[%s2715_s13 + $0x40] sm:$0xff] }
 0x739   :  { %v1324_v9 = vpop.permute.xlu1 %1323 }
 0x73a   :  { %v1327_v11 = vpop.permute.xlu0 %1326  ;;  %v1338_v18 = vsel %vm2741_vm12, %v1337_v17, %v1324_v9  ;;  %v1464_v9 = vld [vmem:[%s2715_s13 + $0x70] sm:$0xff]  ;;  %v1457_v17 = vld [vmem:[%s2715_s13 + $0x38] sm:$0xff] }
 0x73b   :  { %v1339_v21 = vsel %vm2743_vm14, %v1338_v18, %v1327_v11  ;;  %v1463_v11 = vld [vmem:[%s2715_s13 + $0x68] sm:$0xff]  ;;  %1471 = vmatpush.msra.mxu2 %v1464_v9 }
 0x73c   :  { %v1340_v29 = vsel %vm694_vm1, %v1339_v21, %v1330_v12  ;;  %v1462_v12 = vld [vmem:[%s2715_s13 + $0x60] sm:$0xff]  ;;  %v1455_v18 = vld [vmem:[%s2715_s13 + $0x28] sm:$0xff]  ;;  %v1452_v21 = vld [vmem:[%s2715_s13 + $0x10] sm:$0xff] }
 0x73d   :  { %1472 = vmatpush.msra.mxu2 %v1463_v11 }
 0x73f   :  { %1473 = vmatpush.msra.mxu2 %v1462_v12 }
 0x741   :  { %v1333_v13 = vpop.permute.xlu1 %1332  ;;  %1474 = vmatpush.msra.mxu2 %v1461_v14 }
 0x742   :  { %v1348_v15 = vpop.permute.xlu0 %1347  ;;  %v1341_v25 = vsel %vm696_vm9, %v1340_v29, %v1333_v13  ;;  %v1460_v13 = vld [vmem:[%s2715_s13 + $0x50] sm:$0xff] }
 0x743   :  { %v1368_v19 = vsel %vm2742_vm10, %v1311_v2, %v1348_v15  ;;  %v1342_v32 = vperm.slane %v1341_v25, 0  ;;  %v1459_v15 = vld [vmem:[%s2715_s13 + $0x48] sm:$0xff]  ;;  %1475 = vmatpush.msra.mxu2 %v1460_v13 }
 0x744   :  { %v1369_v24 = vsel %vm2744_vm15, %v1368_v19, %v1351_v22  ;;  %v1456_v22 = vld [vmem:[%s2715_s13 + $0x30] sm:$0xff]  ;;  %v1454_v19 = vld [vmem:[%s2715_s13 + $0x20] sm:$0xff] }
 0x745   :  { %v1343_v48 = vmul.f32 %v1342_v32, %v2562_v59  ;;  %v1344_v36 = vmul.f32 %v1342_v32, %v2566_v63  ;;  %1476 = vmatpush.msra.mxu2 %v1459_v15 }
 0x747   :  { %1477 = vmatpush.msra.mxu2 %v1458_v16 }
 0x749   :  { %v1354_v20 = vpop.permute.xlu1 %1353  ;;  %1478 = vmatpush.msra.mxu2 %v1457_v17 }
 0x74a   :  { %v1357_v23 = vpop.permute.xlu0 %1356  ;;  %v1370_v27 = vsel %vm2745_vm8, %v1369_v24, %v1354_v20  ;;  %vm2748_vm8 = vcmask 1042432   ;;  %v1453_v20 = vld [vmem:[%s2715_s13 + $0x18] sm:$0xff]  ;;  %v1450_v24 = vld [vmem:[%s2715_s13] sm:$0xff] }
 0x74b   :  { %v1371_v30 = vsel %vm2746_vm0, %v1370_v27, %v1357_v23  ;;  %1479 = vmatpush.msra.mxu2 %v1456_v22  ;;  %v1451_v23 = vld [vmem:[%s2715_s13 + $0x8] sm:$0xff]  ;;  %s1660_s13 = smov [#allocation2]  }
 0x74c   :  { %v1372_v33 = vsel %vm2747_vm11, %v1371_v30, %v1360_v31  ;;  %s1497_s24 = sshll.u32 %s1660_s13, 4  ;;  %s1498_s24 = int_to_ptr.vmem [resolvable:$true] %s1497_s24 }
 0x74d   :  { %1480 = vmatpush.msra.mxu2 %v1455_v18 }
 0x74f   :  { %1481 = vmatpush.msra.mxu2 %v1454_v19 }
 0x751   :  { %v1366_v42 = vpop.permute.xlu1 %1365  ;;  %1482 = vmatpush.msra.mxu2 %v1453_v20 }
 0x752   :  { %v1363_v34 = vpop.permute.xlu0 %1362 }
 0x753   :  { %v1373_v35 = vsel %vm694_vm1, %v1372_v33, %v1363_v34  ;;  %1483 = vmatpush.msra.mxu2 %v1452_v21  ;;  %vm2755_vm1 = vcmask 785408   ;;  %v1611_v34 = vld [vmem:[%s2716_s14] ss:$0 sm:$0xff] }
 0x754   :  { %v1374_v43 = vsel %vm696_vm9, %v1373_v35, %v1366_v42  ;;  %vm1490_vm9 = vcmask 74752  }
 0x755   :  { %v1375_v38 = vperm.slane %v1374_v43, 0  ;;  %1484 = vmatpush.msra.mxu2 %v1451_v23 }
 0x757   :  { %v1376_v28 = vadd.f32 %v1375_v38, %v1343_v48  ;;  %v1377_v47 = vadd.f32 %v1375_v38, %v1344_v36  ;;  %1485 = vmatpush.msra.mxu2 %v1450_v24 }
 0x759   :  { %v1378_v57 = vmax.f32 %v1376_v28, 0.0  ;;  %v1379_v37 = vmax.f32 %v1377_v47, 0.0 }
 0x75b   :  { %v1382_v44 = vrot.slane %v1378_v57, 1  ;;  %v1383_v39 = vrot.slane %v1379_v37, 1 }
 0x75d   :  { %v1384_v40 = vsel %vm121_vm4, %v1382_v44, %v1383_v39  ;;  %v1388_v10 = vmax.f32 %v1379_v37, %v1383_v39 }
 0x75e   :  { %v1387_v41 = vmax.f32 %v1378_v57, %v1384_v40 }
 0x75f   :  { %v1397_v49 = vrot.slane %v1388_v10, 4  ;;  %v1399_v63 = vrot.slane %v1388_v10, 5  ;;  %v1401_v51 = vrot.slane %v1388_v10, 6  ;;  %v1403_v53 = vrot.slane %v1388_v10, 7 }
 0x760   :  { %v1390_v45 = vrot.slane %v1387_v41, 1  ;;  %v1392_v5 = vrot.slane %v1387_v41, 2  ;;  %v1394_v26 = vrot.slane %v1387_v41, 3 }
 0x762   :  { %v1405_v46 = vsel %vm71_vm2, %v1387_v41, %v1390_v45 }
 0x763   :  { %v1406_v59 = vsel %vm103_vm3, %v1405_v46, %v1392_v5  ;;  %vm2749_vm3 = vmmov %vm2742_vm10 }
 0x764   :  { %v1407_v50 = vsel %vm2748_vm8, %v1406_v59, %v1394_v26 }
 0x765   :  { %v1408_v52 = vsel %vm139_vm7, %v1407_v50, %v1397_v49  ;;  %vm2754_vm7 = vcmask 523264  }
 0x766   :  { %v1409_v54 = vsel %vm127_vm6, %v1408_v52, %v1399_v63  ;;  %vm2753_vm6 = vmmov %vm2746_vm0 }
 0x767   :  { %v1410_v55 = vsel %vm112_vm5, %v1409_v54, %v1401_v51  ;;  %vm2751_vm5 = vmmov %vm2740_vm13 }
 0x768   :  { %v1411_v56 = vsel %vm121_vm4, %v1410_v55, %v1403_v53  ;;  %vm2750_vm4 = vmmov %vm2744_vm15 }
 0x769   :  { %1413 = vrot.lane.b32.xlu2 %v1411_v56, %s1647_s5 }
 0x7c3   :  { %v1414_v58 = vpop.permute.xlu2 %1413 }
 0x7c4   :  { %v1416_v6 = vmax.f32 %v1411_v56, %v1414_v58 }
 0x7c6   :  { %1424 = vrot.lane.b32.xlu2 %v1416_v6, %s1652_s21  ;;  %1421 = vrot.lane.b32.xlu1 %v1416_v6, %s1649_s11 }
 0x7c7   :  { %1418 = vrot.lane.b32.xlu0 %v1416_v6, %s1647_s5 }
 0x820   :  { %v1425_v1 = vpop.permute.xlu2 %1424 }
 0x838   :  { %v1422_v61 = vpop.permute.xlu1 %1421 }
 0x839   :  { %v1419_v62 = vpop.permute.xlu0 %1418 }
 0x83a   :  { %v1427_v0 = vsel %vm2749_vm3, %v1416_v6, %v1419_v62 }
 0x83b   :  { %v1428_v2 = vsel %vm2750_vm4, %v1427_v0, %v1422_v61 }
 0x83c   :  { %v1429_v3 = vsel %vm2751_vm5, %v1428_v2, %v1425_v1 }
 0x83d   :  { %v1439_v4 = vrot.slane %v1429_v3, 3  ;;  %v1435_v7 = vrot.slane %v1429_v3, 2  ;;  %v1431_v8 = vrot.slane %v1429_v3, 1 }
 0x83f   :  { %1440 = vrot.lane.b32.xlu2 %v1439_v4, %s1648_s2  ;;  %1436 = vrot.lane.b32.xlu1 %v1435_v7, %s2752_s23  ;;  %s1499_s2 = sshll.u32 %s2717_s15, 4  ;;  %s1500_s2 = int_to_ptr.hbm [resolvable:$true] %s1499_s2 }
 0x840   :  { %1432 = vrot.lane.b32.xlu0 %v1431_v8, %s1658_s0 }
 0x899   :  { %v1441_v30 = vpop.permute.xlu2 %1440 }
 0x8b1   :  { %v1437_v27 = vpop.permute.xlu1 %1436 }
 0x8b2   :  { %v1433_v29 = vpop.permute.xlu0 %1432 }
 0x8b3   :  { %v1443_v25 = vsel %vm2753_vm6, %v1429_v3, %v1433_v29 }
 0x8b4   :  { %v1444_v31 = vsel %vm2754_vm7, %v1443_v25, %v1437_v27 }
 0x8b5   :  { %v1445_v32 = vsel %vm2755_vm1, %v1444_v31, %v1441_v30 }
 0x8b6   :  { %v1447_v42 = vrot.slane %v1445_v32, 3 }
 0x8b8   :  { %v1449_v33 = vsel %vm71_vm2, %v1445_v32, %v1447_v42 }
 0x8b9   :  { %1486 = vmatmul.f32.vlgmr.msra.gmra.mxu2 %v1449_v33 }
 0x93c   :  { %v1487_v35 = vpop.f32.mrf.mxu2 }
 0x93d   :  { %v1488_v43 = vadd.f32 %v1611_v34, %v1487_v35 }
 0x93f   :  { %1491 = vst.msk [vmem:[#allocation2] sm:$0x3] %vm1490_vm9, %v1488_v43 }
 0x940   :  { %1502 = dma.vmem_to_hbm [thread:$0]  %s1498_s24, 32, %s1500_s2, [#allocation3]  }
 0x941   :  { %1640 = dma.done.wait [#allocation3], 32  }
 0x942   :  { %1641 = vsyncadd [#allocation3], 4294967264 }
 0x943   :  { %1507 = vsyncpa [#allocation3], 1 }

</bundles_post_ra>
